<compile_context>
chip_gen: v5e
topology: v5e:2x2
jax: 0.10.0
libtpu: 0.0.40
codegen_flags: <defaults>
</compile_context>

<pallas_src>
import functools

import jax
import jax.numpy as jnp
from jax.experimental import pallas as pl
from jax.experimental.pallas import tpu as pltpu

_C_PAD = 128   # lane-padded class dim fed to the MXU (MXU minimum width)
_OUT_W = 8     # narrow HBM output slab: [logit0, logit1, prob0, prob1, 0, 0, 0, 0]


def _round_up(x, m):
    return ((x + m - 1) // m) * m


def _mil_fc_kernel(h_ref, w1_ref, b1_ref, w2_ref, b2_ref, out_ref):
    # Per-tile f32 -> bf16 cast (free filler; avoids a separate wrapper HBM pass).
    h_bf = h_ref[...].astype(jnp.bfloat16)

    # Linear(D, H) + ReLU.  bf16 operands, f32 accumulation on the MXU.
    hidden = jnp.dot(h_bf, w1_ref[...], preferred_element_type=jnp.float32)
    hidden = jnp.maximum(hidden + b1_ref[...], 0.0)                     # (TILE_N, H) f32

    # Linear(H, C) with the class dim padded to 128 lanes (cols >= C are zero).
    logits_pad = jnp.dot(hidden.astype(jnp.bfloat16), w2_ref[...],
                         preferred_element_type=jnp.float32) + b2_ref[...]  # (TILE_N, 128)

    # 2-class softmax, exact closed form: p1 = sigmoid(l1 - l0), p0 = 1 - p1.
    l0 = logits_pad[:, 0:1]
    l1 = logits_pad[:, 1:2]
    p1 = 1.0 / (1.0 + jnp.exp(l0 - l1))                                 # (TILE_N, 1)
    p0 = 1.0 - p1

    # Narrow 8-lane result: cols 0,1 = logits, cols 2,3 = probs, cols 4..7 = 0.
    logits8 = logits_pad[:, :_OUT_W]          # cols 2..7 are exactly zero (zero pad)
    col = jax.lax.broadcasted_iota(jnp.int32, logits8.shape, 1)
    out_ref[...] = (logits8
                    + jnp.where(col == 2, p0, 0.0)
                    + jnp.where(col == 3, p1, 0.0))


@functools.partial(jax.jit, static_argnames=("tile_n",))
def mil_fc_pallas(h, w1, b1, w2, b2, *, tile_n=2048):
    """Classifier hot path.  Returns (logits (N, C), y_probs (N, C))."""
    N, D = h.shape
    H = w1.shape[1]
    C = w2.shape[1]
    # The in-kernel closed-form softmax and column packing assume 2 classes
    # (mirrors the module's `assert n_classes == 2`).
    assert C == 2, "MIL_fc Pallas kernel only supports n_classes == 2"

    # Multiple-of-16 row tiles; cap at ~N/2 so there are >= 2 grid steps when
    # possible (lets v7x shard the 'parallel' axis over both TensorCores).
    tile_n = max(16, min(tile_n, _round_up(pl.cdiv(N, 2), 16)))
    n_grid = pl.cdiv(N, tile_n)

    # Weights as bf16 MXU operands; class dim padded to 128 lanes (zeros).
    w1_bf = w1.astype(jnp.bfloat16)
    w2_pad = jnp.zeros((H, _C_PAD), jnp.bfloat16).at[:, :C].set(w2.astype(jnp.bfloat16))
    b2_pad = jnp.zeros((1, _C_PAD), jnp.float32).at[:, :C].set(b2.astype(jnp.float32))
    b1_f = b1.astype(jnp.float32).reshape(1, H)

    out = pl.pallas_call(
        _mil_fc_kernel,
        out_shape=jax.ShapeDtypeStruct((N, _OUT_W), jnp.float32),
        grid=(n_grid,),
        in_specs=[
            pl.BlockSpec((tile_n, D), lambda i: (i, 0)),     # h: streams with i (f32)
            pl.BlockSpec((D, H), lambda i: (0, 0)),          # W1: VMEM-resident
            pl.BlockSpec((1, H), lambda i: (0, 0)),          # b1
            pl.BlockSpec((H, _C_PAD), lambda i: (0, 0)),     # W2 (lane-padded)
            pl.BlockSpec((1, _C_PAD), lambda i: (0, 0)),     # b2 (lane-padded)
        ],
        out_specs=pl.BlockSpec((tile_n, _OUT_W), lambda i: (i, 0)),
        compiler_params=pltpu.CompilerParams(
            dimension_semantics=("parallel",),
            vmem_limit_bytes=48 * 1024 * 1024,
        ),
    )(h, w1_bf, b1_f, w2_pad, b2_pad)

    # cols 0:C are logits, cols C:2C are softmax probs; tiny (N, 8) slab.
    logits = out[:, 0:C]
    y_probs = out[:, C:2 * C]
    return logits, y_probs


def mil_fc_forward(h, params, top_k=1):
    """Reproduces MIL_fc.forward(h) with return_features=False."""
    w1, b1, w2, b2 = params
    logits, y_probs = mil_fc_pallas(h, w1, b1, w2, b2)               # (N, 2), (N, 2)

    # top-k over the class-1 probability (top_k == 1 in the module).
    _, top_instance_idx = jax.lax.top_k(y_probs[:, 1], top_k)        # (top_k,)
    top_instance = jnp.take(logits, top_instance_idx, axis=0)        # (top_k, 2)
    Y_hat = jnp.argmax(top_instance, axis=1, keepdims=True)          # (top_k, 1)
    Y_prob = jax.nn.softmax(top_instance, axis=1)                    # (top_k, 2)
    results_dict = {}
    return top_instance, Y_prob, Y_hat, y_probs, results_dict


def init_params(key, encoding_size=1024, hidden=512, n_classes=2):
    k1, k2 = jax.random.split(key, 2)
    # deterministic xavier-like init (module uses initialize_weights -> xavier_normal_)
    w1 = jax.random.normal(k1, (encoding_size, hidden), jnp.float32) * jnp.sqrt(
        2.0 / (encoding_size + hidden))
    b1 = jnp.zeros((1, hidden), jnp.float32)
    w2 = jax.random.normal(k2, (hidden, n_classes), jnp.float32) * jnp.sqrt(
        2.0 / (hidden + n_classes))
    b2 = jnp.zeros((1, n_classes), jnp.float32)
    return w1, b1, w2, b2


if __name__ == "__main__":
    key = jax.random.PRNGKey(0)
    kh, kp = jax.random.split(key)

    N = 64           # number of bag instances (small test size)
    D = 1024         # encoding_size (module default)
    params = init_params(kp, encoding_size=D, hidden=512, n_classes=2)
    h = jax.random.normal(kh, (N, D), jnp.float32)
    w1, b1, w2, b2 = params

    top_instance, Y_prob, Y_hat, y_probs, results = mil_fc_forward(h, params, top_k=1)
    logits, y_probs2 = mil_fc_pallas(h, w1, b1, w2, b2)
    jax.block_until_ready((top_instance, Y_prob, Y_hat, y_probs, logits, y_probs2))

    # Sanity check vs. a JAX reference that uses the same bf16 MXU path.
    ref_hidden = jnp.maximum(
        jnp.dot(h.astype(jnp.bfloat16), w1.astype(jnp.bfloat16),
                preferred_element_type=jnp.float32) + b1, 0.0)
    ref_logits = jnp.dot(ref_hidden.astype(jnp.bfloat16), w2.astype(jnp.bfloat16),
                         preferred_element_type=jnp.float32) + b2
    ref_probs = jax.nn.softmax(ref_logits, axis=1)

    assert jnp.allclose(logits, ref_logits, atol=1e-2, rtol=1e-2), "logits mismatch"
    assert jnp.allclose(y_probs, ref_probs, atol=1e-2), "probs mismatch"
    assert jnp.allclose(jnp.sum(y_probs, axis=1), 1.0, atol=1e-3), "probs not normalized"
    assert top_instance.shape == (1, 2)
    assert Y_prob.shape == (1, 2)
    assert Y_hat.shape == (1, 1)
    assert y_probs.shape == (N, 2)

    print("KERNEL_OK")
</pallas_src>

<mosaic_0001>
module attributes {stable_mosaic.version = 11 : i64} {
  func.func @_mil_fc_kernel(%arg0: i32, %arg1: memref<32x1024xf32, #tpu.memory_space<vmem>>, %arg2: memref<1024x512xbf16, #tpu.memory_space<vmem>>, %arg3: memref<1x512xf32, #tpu.memory_space<vmem>>, %arg4: memref<512x128xbf16, #tpu.memory_space<vmem>>, %arg5: memref<1x128xf32, #tpu.memory_space<vmem>>, %arg6: memref<32x8xf32, #tpu.memory_space<vmem>>) attributes {dimension_semantics = [#tpu.dimension_semantics<parallel>], iteration_bounds = array<i64: 2>, scalar_prefetch = 0 : i64, scratch_operands = 0 : i64, tpu.core_type = #tpu.core_type<tc>, window_params = [{transform_indices = @transform_0, window_bounds = array<i64: 32, 1024>}, {pipeline_mode = #tpu.pipeline_mode<synchronous>, transform_indices = @transform_1, window_bounds = array<i64: 1024, 512>}, {pipeline_mode = #tpu.pipeline_mode<synchronous>, transform_indices = @transform_2, window_bounds = array<i64: 1, 512>}, {pipeline_mode = #tpu.pipeline_mode<synchronous>, transform_indices = @transform_3, window_bounds = array<i64: 512, 128>}, {pipeline_mode = #tpu.pipeline_mode<synchronous>, transform_indices = @transform_4, window_bounds = array<i64: 1, 128>}, {transform_indices = @transform_5, window_bounds = array<i64: 32, 8>}]} {
    %c0 = arith.constant 0 : index
    %c0_0 = arith.constant 0 : index
    %0 = vector.load %arg1[%c0, %c0_0] : memref<32x1024xf32, #tpu.memory_space<vmem>>, vector<32x1024xf32>
    %1 = arith.truncf %0 : vector<32x1024xf32> to vector<32x1024xbf16>
    %c0_1 = arith.constant 0 : index
    %c0_2 = arith.constant 0 : index
    %2 = vector.load %arg2[%c0_1, %c0_2] : memref<1024x512xbf16, #tpu.memory_space<vmem>>, vector<1024x512xbf16>
    %cst = arith.constant dense<0.000000e+00> : vector<32x512xf32>
    %3 = tpu.matmul %1, %2, %cst {dimension_numbers = #tpu.dot_dimension_numbers<[1], [0], [0], [1], [0, 0, 1, 1], [], []>} : vector<32x1024xbf16>, vector<1024x512xbf16>, vector<32x512xf32> -> vector<32x512xf32>
    %c0_3 = arith.constant 0 : index
    %c0_4 = arith.constant 0 : index
    %4 = vector.load %arg3[%c0_3, %c0_4] : memref<1x512xf32, #tpu.memory_space<vmem>>, vector<1x512xf32>
    %5 = vector.broadcast %4 : vector<1x512xf32> to vector<32x512xf32>
    %6 = arith.addf %3, %5 : vector<32x512xf32>
    %cst_5 = arith.constant 0.000000e+00 : f32
    %7 = vector.broadcast %cst_5 : f32 to vector<32x512xf32>
    %8 = arith.maximumf %6, %7 : vector<32x512xf32>
    %9 = arith.truncf %8 : vector<32x512xf32> to vector<32x512xbf16>
    %c0_6 = arith.constant 0 : index
    %c0_7 = arith.constant 0 : index
    %10 = vector.load %arg4[%c0_6, %c0_7] : memref<512x128xbf16, #tpu.memory_space<vmem>>, vector<512x128xbf16>
    %cst_8 = arith.constant dense<0.000000e+00> : vector<32x128xf32>
    %11 = tpu.matmul %9, %10, %cst_8 {dimension_numbers = #tpu.dot_dimension_numbers<[1], [0], [0], [1], [0, 0, 1, 1], [], []>} : vector<32x512xbf16>, vector<512x128xbf16>, vector<32x128xf32> -> vector<32x128xf32>
    %c0_9 = arith.constant 0 : index
    %c0_10 = arith.constant 0 : index
    %12 = vector.load %arg5[%c0_9, %c0_10] : memref<1x128xf32, #tpu.memory_space<vmem>>, vector<1x128xf32>
    %13 = vector.broadcast %12 : vector<1x128xf32> to vector<32x128xf32>
    %14 = arith.addf %11, %13 : vector<32x128xf32>
    %15 = vector.extract_strided_slice %14 {offsets = [0, 0], sizes = [32, 1], strides = [1, 1]} : vector<32x128xf32> to vector<32x1xf32>
    %16 = vector.extract_strided_slice %14 {offsets = [0, 1], sizes = [32, 1], strides = [1, 1]} : vector<32x128xf32> to vector<32x1xf32>
    %17 = arith.subf %15, %16 : vector<32x1xf32>
    %18 = math.exp %17 : vector<32x1xf32>
    %cst_11 = arith.constant 1.000000e+00 : f32
    %19 = vector.broadcast %cst_11 : f32 to vector<32x1xf32>
    %20 = arith.addf %19, %18 : vector<32x1xf32>
    %cst_12 = arith.constant 1.000000e+00 : f32
    %21 = vector.broadcast %cst_12 : f32 to vector<32x1xf32>
    %22 = arith.divf %21, %20 : vector<32x1xf32>
    %cst_13 = arith.constant 1.000000e+00 : f32
    %23 = vector.broadcast %cst_13 : f32 to vector<32x1xf32>
    %24 = arith.subf %23, %22 : vector<32x1xf32>
    %25 = vector.extract_strided_slice %14 {offsets = [0, 0], sizes = [32, 8], strides = [1, 1]} : vector<32x128xf32> to vector<32x8xf32>
    %26 = tpu.iota {dimensions = array<i32: 1>} : vector<32x8xi32>
    %c2_i32 = arith.constant 2 : i32
    %27 = vector.broadcast %c2_i32 : i32 to vector<32x8xi32>
    %28 = arith.cmpi eq, %26, %27 : vector<32x8xi32>
    %cst_14 = arith.constant 0.000000e+00 : f32
    %29 = vector.shape_cast %24 : vector<32x1xf32> to vector<32x1xf32>
    %30 = vector.broadcast %29 : vector<32x1xf32> to vector<32x8xf32>
    %31 = vector.broadcast %cst_14 : f32 to vector<32x8xf32>
    %32 = arith.select %28, %30, %31 : vector<32x8xi1>, vector<32x8xf32>
    %33 = arith.addf %25, %32 : vector<32x8xf32>
    %c3_i32 = arith.constant 3 : i32
    %34 = vector.broadcast %c3_i32 : i32 to vector<32x8xi32>
    %35 = arith.cmpi eq, %26, %34 : vector<32x8xi32>
    %cst_15 = arith.constant 0.000000e+00 : f32
    %36 = vector.shape_cast %22 : vector<32x1xf32> to vector<32x1xf32>
    %37 = vector.broadcast %36 : vector<32x1xf32> to vector<32x8xf32>
    %38 = vector.broadcast %cst_15 : f32 to vector<32x8xf32>
    %39 = arith.select %35, %37, %38 : vector<32x8xi1>, vector<32x8xf32>
    %40 = arith.addf %33, %39 : vector<32x8xf32>
    %c0_16 = arith.constant 0 : index
    %c0_17 = arith.constant 0 : index
    %41 = vector.load %arg6[%c0_16, %c0_17] : memref<32x8xf32, #tpu.memory_space<vmem>>, vector<32x8xf32>
    tpu.vector_store %arg6[%c0_16, %c0_17], %40 {strides = array<i32>} : memref<32x8xf32, #tpu.memory_space<vmem>>, vector<32x8xf32>,
    return
  }
  func.func @transform_0(%arg0: i32) -> (i32, i32) {
    %c0_i32 = arith.constant 0 : i32
    %c0_i32_0 = arith.constant 0 : i32
    return %arg0, %c0_i32 : i32, i32
  }
  func.func @transform_1(%arg0: i32) -> (i32, i32) {
    %c0_i32 = arith.constant 0 : i32
    %c0_i32_0 = arith.constant 0 : i32
    %c0_i32_1 = arith.constant 0 : i32
    return %c0_i32, %c0_i32_0 : i32, i32
  }
  func.func @transform_2(%arg0: i32) -> (i32, i32) {
    %c0_i32 = arith.constant 0 : i32
    %c0_i32_0 = arith.constant 0 : i32
    %c0_i32_1 = arith.constant 0 : i32
    return %c0_i32, %c0_i32_0 : i32, i32
  }
  func.func @transform_3(%arg0: i32) -> (i32, i32) {
    %c0_i32 = arith.constant 0 : i32
    %c0_i32_0 = arith.constant 0 : i32
    %c0_i32_1 = arith.constant 0 : i32
    return %c0_i32, %c0_i32_0 : i32, i32
  }
  func.func @transform_4(%arg0: i32) -> (i32, i32) {
    %c0_i32 = arith.constant 0 : i32
    %c0_i32_0 = arith.constant 0 : i32
    %c0_i32_1 = arith.constant 0 : i32
    return %c0_i32, %c0_i32_0 : i32, i32
  }
  func.func @transform_5(%arg0: i32) -> (i32, i32) {
    %c0_i32 = arith.constant 0 : i32
    %c0_i32_0 = arith.constant 0 : i32
    return %arg0, %c0_i32 : i32, i32
  }
}

</mosaic_0001>

<bundles_post_ra>
// kernel: mil_fc_pallas.1
= control target key start
LH: loop header
LB: loop body
LE: loop exit
PB: predicated region body
PF: predicated region fallthrough
CT: control target
= control target key end

     0   :  { %s4534_s18 = smov 0   ;;  %s6440_s0 = inlined_call_operand.vmem [shape: f32[64,1024], index: 0, kind: input, shape index: {}]   ;;  %s6441_s1 = inlined_call_operand.vmem [shape: bf16[1024,512], index: 1, kind: input, shape index: {}]   ;;  %s6442_s2 = inlined_call_operand.vmem [shape: f32[1,512], index: 2, kind: input, shape index: {}]   ;;  %s6443_s3 = inlined_call_operand.vmem [shape: bf16[512,128], index: 3, kind: input, shape index: {}]   ;;  %s6444_s4 = inlined_call_operand.vmem [shape: f32[1,128], index: 4, kind: input, shape index: {}]   ;;  %s6445_s5 = inlined_call_operand.vmem [shape: f32[64,8], index: 5, kind: output, shape index: {}]  }
   0x1 LB: > { %s3010_s19 = sadd.s32 4294967295, %s4500_s18   ;;  %p3014_p0 = scmp.ge.s32.totalorder %s4500_s18, 1  ;;  %s4500_s18 = sphi %s4534_s18, %s15_s18  }
   0x2   : > { %p189_p1 = scmp.lt.s32.totalorder %s4500_s18, 3 }
   0x4   : > { %p190_p2 = pnand %p3014_p0, %p189_p1 }
   0x5   : > { %s3015_s11 = sshll.u32 (!%p190_p2), %s3010_s19, 2  ;;  %s4502_s23 = smov (!%p190_p2), 127  }
   0x6   : > { %193 = sbr.rel (%p190_p2) target bundleno = 849 (0x351), region = 40  ;;  %p219_p3 = scmp.lt.s32.totalorder (!%p190_p2), %s3015_s11, 7 }
   0xb   : > { %v3134_v0 = vld [vmem:[%s6441_s1 + $0xe0] sm:$0xf]  ;;  %v4205_v1 = vld [vmem:[%s6441_s1 + $0xec] sm:$0xf0]  ;;  %s6447_s11 = smov (!%p219_p3, %s3015_s11), 7 }
   0xc   : > { %v3262_v2 = vld [vmem:[%s6441_s1 + $0x1e0] sm:$0xf]  ;;  %v3135_v3 = vor.u32 %v4205_v1, %v3134_v0  ;;  %v4237_v4 = vld [vmem:[%s6441_s1 + $0x1ec] sm:$0xf0]  ;;  %s4174_s8 = sshll.u32 %s6447_s11, 6  ;;  %s3019_s24 = sshll.u32 %s6447_s11, 3 }
   0xd   : > { %v3390_v5 = vld [vmem:[%s6441_s1 + $0x2e0] sm:$0xf]  ;;  %v4269_v6 = vld [vmem:[%s6441_s1 + $0x2ec] sm:$0xf0]  ;;  %v3263_v7 = vor.u32 %v4237_v4, %v3262_v2  ;;  %s4748_s16 = scalar_lea.vmem %s6440_s0, %s4174_s8  ;;  %s229_s27 = scalar_lea.vmem %s6445_s5, %s3019_s24 }
   0xe   : > { %v3391_v8 = vor.u32 %v4269_v6, %v3390_v5  ;;  %v3518_v9 = vld [vmem:[%s6441_s1 + $0x3e0] sm:$0xf]  ;;  %v4301_v10 = vld [vmem:[%s6441_s1 + $0x3ec] sm:$0xf0]  ;;  %1825 = vmatpush.bf16.msra.mxu0 %v3135_v3 }
   0xf   : > { %v3118_v11 = vld [vmem:[%s6441_s1 + $0xc0] sm:$0xf]  ;;  %v3519_v12 = vor.u32 %v4301_v10, %v3518_v9  ;;  %v4201_v13 = vld [vmem:[%s6441_s1 + $0xcc] sm:$0xf0]  ;;  %1844 = vmatpush.bf16.msra.mxu1 %v3263_v7 }
  0x10   : > { %v3246_v14 = vld [vmem:[%s6441_s1 + $0x1c0] sm:$0xf]  ;;  %v4233_v15 = vld [vmem:[%s6441_s1 + $0x1cc] sm:$0xf0]  ;;  %1863 = vmatpush.bf16.msra.mxu2 %v3391_v8  ;;  %v3119_v16 = vor.u32 %v4201_v13, %v3118_v11 }
  0x11   : > { %v3247_v17 = vor.u32 %v4233_v15, %v3246_v14  ;;  %v3374_v18 = vld [vmem:[%s6441_s1 + $0x2c0] sm:$0xf]  ;;  %v4265_v19 = vld [vmem:[%s6441_s1 + $0x2cc] sm:$0xf0]  ;;  %1882 = vmatpush.bf16.msra.mxu3 %v3519_v12 }
  0x12   : > { %v3502_v20 = vld [vmem:[%s6441_s1 + $0x3c0] sm:$0xf]  ;;  %v3375_v21 = vor.u32 %v4265_v19, %v3374_v18  ;;  %v4297_v22 = vld [vmem:[%s6441_s1 + $0x3cc] sm:$0xf0]  ;;  %1826 = vmatpush.bf16.msra.mxu0 %v3119_v16 }
  0x13   : > { %v3102_v23 = vld [vmem:[%s6441_s1 + $0xa0] sm:$0xf]  ;;  %v4197_v24 = vld [vmem:[%s6441_s1 + $0xac] sm:$0xf0]  ;;  %v3503_v25 = vor.u32 %v4297_v22, %v3502_v20  ;;  %1845 = vmatpush.bf16.msra.mxu1 %v3247_v17 }
  0x14   : > { %v3230_v26 = vld [vmem:[%s6441_s1 + $0x1a0] sm:$0xf]  ;;  %v4229_v27 = vld [vmem:[%s6441_s1 + $0x1ac] sm:$0xf0]  ;;  %v3103_v29 = vor.u32 %v4197_v24, %v3102_v23  ;;  %1864 = vmatpush.bf16.msra.mxu2 %v3375_v21 }
  0x15   : > { %v3358_v28 = vld [vmem:[%s6441_s1 + $0x2a0] sm:$0xf]  ;;  %v4261_v30 = vld [vmem:[%s6441_s1 + $0x2ac] sm:$0xf0]  ;;  %v3231_v33 = vor.u32 %v4229_v27, %v3230_v26  ;;  %1883 = vmatpush.bf16.msra.mxu3 %v3503_v25 }
  0x16   : > { %v3486_v31 = vld [vmem:[%s6441_s1 + $0x3a0] sm:$0xf]  ;;  %v4293_v32 = vld [vmem:[%s6441_s1 + $0x3ac] sm:$0xf0]  ;;  %v3359_v34 = vor.u32 %v4261_v30, %v3358_v28  ;;  %1827 = vmatpush.bf16.msra.mxu0 %v3103_v29 }
  0x17   : > { %v3086_v35 = vld [vmem:[%s6441_s1 + $0x80] sm:$0xf]  ;;  %v4193_v36 = vld [vmem:[%s6441_s1 + $0x8c] sm:$0xf0]  ;;  %v3487_v38 = vor.u32 %v4293_v32, %v3486_v31  ;;  %1846 = vmatpush.bf16.msra.mxu1 %v3231_v33 }
  0x18   : > { %v3214_v37 = vld [vmem:[%s6441_s1 + $0x180] sm:$0xf]  ;;  %v4225_v39 = vld [vmem:[%s6441_s1 + $0x18c] sm:$0xf0]  ;;  %v3087_v44 = vor.u32 %v4193_v36, %v3086_v35  ;;  %1865 = vmatpush.bf16.msra.mxu2 %v3359_v34 }
  0x19   : > { %v3342_v40 = vld [vmem:[%s6441_s1 + $0x280] sm:$0xf]  ;;  %v4257_v41 = vld [vmem:[%s6441_s1 + $0x28c] sm:$0xf0]  ;;  %v3215_v45 = vor.u32 %v4225_v39, %v3214_v37  ;;  %1884 = vmatpush.bf16.msra.mxu3 %v3487_v38  ;;  %v232_v39 = vld [vmem:[%s4748_s16 + $0x8] sm:$0xff] }
  0x1a   : > { %v3470_v42 = vld [vmem:[%s6441_s1 + $0x380] sm:$0xf]  ;;  %v4289_v43 = vld [vmem:[%s6441_s1 + $0x38c] sm:$0xf0]  ;;  %v3343_v46 = vor.u32 %v4257_v41, %v3342_v40  ;;  %1828 = vmatpush.bf16.msra.mxu0 %v3087_v44  ;;  %v240_v44 = vld [vmem:[%s4748_s16 + $0x48] sm:$0xff] }
  0x1b   : > { %v3070_v47 = vld [vmem:[%s6441_s1 + $0x60] sm:$0xf]  ;;  %v4189_v48 = vld [vmem:[%s6441_s1 + $0x6c] sm:$0xf0]  ;;  %v3471_v50 = vor.u32 %v4289_v43, %v3470_v42  ;;  %1847 = vmatpush.bf16.msra.mxu1 %v3215_v45 }
  0x1c   : > { %v3198_v49 = vld [vmem:[%s6441_s1 + $0x160] sm:$0xf]  ;;  %v4221_v51 = vld [vmem:[%s6441_s1 + $0x16c] sm:$0xf0]  ;;  %v3071_v56 = vor.u32 %v4189_v48, %v3070_v47  ;;  %1866 = vmatpush.bf16.msra.mxu2 %v3343_v46 }
  0x1d   : > { %v3326_v52 = vld [vmem:[%s6441_s1 + $0x260] sm:$0xf]  ;;  %v4253_v53 = vld [vmem:[%s6441_s1 + $0x26c] sm:$0xf0]  ;;  %v3199_v57 = vor.u32 %v4221_v51, %v3198_v49  ;;  %1885 = vmatpush.bf16.msra.mxu3 %v3471_v50  ;;  %v234_v49 = vld [vmem:[%s4748_s16 + $0x18] sm:$0xff] }
  0x1e   : > { %v3454_v54 = vld [vmem:[%s6441_s1 + $0x360] sm:$0xf]  ;;  %v4285_v55 = vld [vmem:[%s6441_s1 + $0x36c] sm:$0xf0]  ;;  %v3327_v58 = vor.u32 %v4253_v53, %v3326_v52  ;;  %1829 = vmatpush.bf16.msra.mxu0 %v3071_v56  ;;  %v242_v50 = vld [vmem:[%s4748_s16 + $0x58] sm:$0xff]  ;;  %v4784_v53 = vpack.c.bf16 %v240_v44, %v232_v39 }
  0x1f   : > { %v3054_v59 = vld [vmem:[%s6441_s1 + $0x40] sm:$0xf]  ;;  %v4185_v60 = vld [vmem:[%s6441_s1 + $0x4c] sm:$0xf0]  ;;  %v3455_v62 = vor.u32 %v4285_v55, %v3454_v54  ;;  %1848 = vmatpush.bf16.msra.mxu1 %v3199_v57  ;;  %v4794_v57 = vpack.c.bf16 %v242_v50, %v234_v49 }
  0x20   : > { %v3182_v61 = vld [vmem:[%s6441_s1 + $0x140] sm:$0xf]  ;;  %v4217_v63 = vld [vmem:[%s6441_s1 + $0x14c] sm:$0xf0]  ;;  %v3055_v4 = vor.u32 %v4185_v60, %v3054_v59  ;;  %1867 = vmatpush.bf16.msra.mxu2 %v3327_v58 }
  0x21   : > { %v3310_v0 = vld [vmem:[%s6441_s1 + $0x240] sm:$0xf]  ;;  %v4249_v1 = vld [vmem:[%s6441_s1 + $0x24c] sm:$0xf0]  ;;  %v3183_v6 = vor.u32 %v4217_v63, %v3182_v61  ;;  %1886 = vmatpush.bf16.msra.mxu3 %v3455_v62 }
  0x22   : > { %v3438_v2 = vld [vmem:[%s6441_s1 + $0x340] sm:$0xf]  ;;  %v4281_v3 = vld [vmem:[%s6441_s1 + $0x34c] sm:$0xf0]  ;;  %v3311_v7 = vor.u32 %v4249_v1, %v3310_v0  ;;  %1830 = vmatpush.bf16.msra.mxu0 %v3055_v4 }
  0x23   : > { %v3038_v5 = vld [vmem:[%s6441_s1 + $0x20] sm:$0xf]  ;;  %v4181_v8 = vld [vmem:[%s6441_s1 + $0x2c] sm:$0xf0]  ;;  %v3439_v11 = vor.u32 %v4281_v3, %v3438_v2  ;;  %1849 = vmatpush.bf16.msra.mxu1 %v3183_v6 }
  0x24   : > { %v3166_v9 = vld [vmem:[%s6441_s1 + $0x120] sm:$0xf]  ;;  %v4213_v10 = vld [vmem:[%s6441_s1 + $0x12c] sm:$0xf0]  ;;  %v3039_v16 = vor.u32 %v4181_v8, %v3038_v5  ;;  %1868 = vmatpush.bf16.msra.mxu2 %v3311_v7 }
  0x25   : > { %v3294_v12 = vld [vmem:[%s6441_s1 + $0x220] sm:$0xf]  ;;  %v4245_v13 = vld [vmem:[%s6441_s1 + $0x22c] sm:$0xf0]  ;;  %v3167_v20 = vor.u32 %v4213_v10, %v3166_v9  ;;  %1887 = vmatpush.bf16.msra.mxu3 %v3439_v11 }
  0x26   : > { %v3422_v14 = vld [vmem:[%s6441_s1 + $0x320] sm:$0xf]  ;;  %v4277_v15 = vld [vmem:[%s6441_s1 + $0x32c] sm:$0xf0]  ;;  %v3295_v21 = vor.u32 %v4245_v13, %v3294_v12  ;;  %1831 = vmatpush.bf16.msra.mxu0 %v3039_v16 }
  0x27   : > { %v3022_v17 = vld [vmem:[%s6441_s1] sm:$0xf]  ;;  %v4177_v18 = vld [vmem:[%s6441_s1 + $0xc] sm:$0xf0]  ;;  %v3423_v24 = vor.u32 %v4277_v15, %v3422_v14  ;;  %1850 = vmatpush.bf16.msra.mxu1 %v3167_v20 }
  0x28   : > { %v3150_v19 = vld [vmem:[%s6441_s1 + $0x100] sm:$0xf]  ;;  %v4209_v22 = vld [vmem:[%s6441_s1 + $0x10c] sm:$0xf0]  ;;  %v3023_v30 = vor.u32 %v4177_v18, %v3022_v17  ;;  %1869 = vmatpush.bf16.msra.mxu2 %v3295_v21 }
  0x29   : > { %v3278_v23 = vld [vmem:[%s6441_s1 + $0x200] sm:$0xf]  ;;  %v4241_v25 = vld [vmem:[%s6441_s1 + $0x20c] sm:$0xf0]  ;;  %v3151_v35 = vor.u32 %v4209_v22, %v3150_v19  ;;  %1888 = vmatpush.bf16.msra.mxu3 %v3423_v24 }
  0x2a   : > { %v3406_v26 = vld [vmem:[%s6441_s1 + $0x300] sm:$0xf]  ;;  %v4273_v27 = vld [vmem:[%s6441_s1 + $0x30c] sm:$0xf0]  ;;  %v3279_v36 = vor.u32 %v4241_v25, %v3278_v23  ;;  %1832 = vmatpush.bf16.msra.mxu0 %v3023_v30 }
  0x2b   : > { %v3902_v28 = vld [vmem:[%s6441_s1 + $0x6e0] sm:$0xf]  ;;  %v4397_v29 = vld [vmem:[%s6441_s1 + $0x6ec] sm:$0xf0]  ;;  %v3407_v43 = vor.u32 %v4273_v27, %v3406_v26  ;;  %1851 = vmatpush.bf16.msra.mxu1 %v3151_v35 }
  0x2c   : > { %v3646_v31 = vld [vmem:[%s6441_s1 + $0x4e0] sm:$0xf]  ;;  %v4333_v32 = vld [vmem:[%s6441_s1 + $0x4ec] sm:$0xf0]  ;;  %v3903_v47 = vor.u32 %v4397_v29, %v3902_v28  ;;  %1870 = vmatpush.bf16.msra.mxu2 %v3279_v36  ;;  %v248_v28 = vld [vmem:[%s4748_s16 + $0x88] sm:$0xff] }
  0x2d   : > { %v3774_v33 = vld [vmem:[%s6441_s1 + $0x5e0] sm:$0xf]  ;;  %v4365_v34 = vld [vmem:[%s6441_s1 + $0x5ec] sm:$0xf0]  ;;  %v3647_v58 = vor.u32 %v4333_v32, %v3646_v31  ;;  %1889 = vmatpush.bf16.msra.mxu3 %v3407_v43  ;;  %v256_v29 = vld [vmem:[%s4748_s16 + $0xc8] sm:$0xff] }
  0x2e   : > { %v231_v37 = vld [vmem:[%s4748_s16] sm:$0xff]  ;;  %v4429_v41 = vld [vmem:[%s6441_s1 + $0x7ec] sm:$0xf0]  ;;  %v3775_v51 = vor.u32 %v4365_v34, %v3774_v33  ;;  %1852 = vmatmul.bf16.vlgmr.msra.gmra.mxu1 %v4784_v53  ;;  %v4900_v50 = vpack.c.bf16 %v256_v29, %v248_v28 }
  0x2f   : > { %v239_v38 = vld [vmem:[%s4748_s16 + $0x40] sm:$0xff]  ;;  %v233_v45 = vld [vmem:[%s4748_s16 + $0x10] sm:$0xff]  ;;  %1901 = vmatpush.bf16.msrb.mxu0 %v3647_v58 }
  0x30   : > { %v4030_v40 = vld [vmem:[%s6441_s1 + $0x7e0] sm:$0xf]  ;;  %v241_v46 = vld [vmem:[%s4748_s16 + $0x50] sm:$0xff]  ;;  %v4777_v48 = vpack.c.bf16 %v239_v38, %v231_v37  ;;  %1939 = vmatpush.bf16.msrb.mxu2 %v3903_v47  ;;  %1920 = vmatpush.bf16.msrb.mxu1 %v3775_v51  ;;  %v250_v37 = vld [vmem:[%s4748_s16 + $0x98] sm:$0xff] }
  0x31   : > { %v3886_v42 = vld [vmem:[%s6441_s1 + $0x6c0] sm:$0xf]  ;;  %v4393_v52 = vld [vmem:[%s6441_s1 + $0x6cc] sm:$0xf0]  ;;  %v4786_v54 = vpack.c.bf16 %v241_v46, %v233_v45  ;;  %v4031_v59 = vor.u32 %v4429_v41, %v4030_v40  ;;  %1890 = vmatmul.bf16.vlgmr.msra.gmra.mxu3 %v4794_v57  ;;  %v258_v38 = vld [vmem:[%s4748_s16 + $0xd8] sm:$0xff] }
  0x32   : > { %v3758_v55 = vld [vmem:[%s6441_s1 + $0x5c0] sm:$0xf]  ;;  %v4361_v56 = vld [vmem:[%s6441_s1 + $0x5cc] sm:$0xf0]  ;;  %v3887_v60 = vor.u32 %v4393_v52, %v3886_v42  ;;  %1833 = vmatmul.bf16.vlgmr.msra.gmra.mxu0 %v4777_v48 }
  0x33   : > { %v3630_v61 = vld [vmem:[%s6441_s1 + $0x4c0] sm:$0xf]  ;;  %v4329_v62 = vld [vmem:[%s6441_s1 + $0x4cc] sm:$0xf0]  ;;  %v3759_v0 = vor.u32 %v4361_v56, %v3758_v55  ;;  %1871 = vmatmul.bf16.vlgmr.msra.gmra.mxu2 %v4786_v54  ;;  %1958 = vmatpush.bf16.msrb.mxu3 %v4031_v59  ;;  %v4910_v56 = vpack.c.bf16 %v258_v38, %v250_v37  ;;  %v4299_v37 = vld [vmem:[%s6441_s1 + $0x3e4] sm:$0xf] }
  0x34   : > { %v4014_v63 = vld [vmem:[%s6441_s1 + $0x7c0] sm:$0xf]  ;;  %v4425_v1 = vld [vmem:[%s6441_s1 + $0x7cc] sm:$0xf0]  ;;  %v3631_v6 = vor.u32 %v4329_v62, %v3630_v61  ;;  %1940 = vmatpush.bf16.msrb.mxu2 %v3887_v60 }
  0x35   : > { %v3870_v2 = vld [vmem:[%s6441_s1 + $0x6a0] sm:$0xf]  ;;  %v4389_v3 = vld [vmem:[%s6441_s1 + $0x6ac] sm:$0xf0]  ;;  %v4015_v7 = vor.u32 %v4425_v1, %v4014_v63  ;;  %1921 = vmatpush.bf16.msrb.mxu1 %v3759_v0 }
  0x36   : > { %v3742_v4 = vld [vmem:[%s6441_s1 + $0x5a0] sm:$0xf]  ;;  %v4357_v5 = vld [vmem:[%s6441_s1 + $0x5ac] sm:$0xf0]  ;;  %v3871_v8 = vor.u32 %v4389_v3, %v3870_v2  ;;  %1902 = vmatpush.bf16.msrb.mxu0 %v3631_v6 }
  0x37   : > { %v3614_v9 = vld [vmem:[%s6441_s1 + $0x4a0] sm:$0xf]  ;;  %v4325_v10 = vld [vmem:[%s6441_s1 + $0x4ac] sm:$0xf0]  ;;  %v3743_v12 = vor.u32 %v4357_v5, %v3742_v4  ;;  %1959 = vmatpush.bf16.msrb.mxu3 %v4015_v7 }
  0x38   : > { %v3998_v11 = vld [vmem:[%s6441_s1 + $0x7a0] sm:$0xf]  ;;  %v4421_v13 = vld [vmem:[%s6441_s1 + $0x7ac] sm:$0xf0]  ;;  %v3615_v18 = vor.u32 %v4325_v10, %v3614_v9  ;;  %1941 = vmatpush.bf16.msrb.mxu2 %v3871_v8 }
  0x39   : > { %v3854_v14 = vld [vmem:[%s6441_s1 + $0x680] sm:$0xf]  ;;  %v4385_v15 = vld [vmem:[%s6441_s1 + $0x68c] sm:$0xf0]  ;;  %v3999_v22 = vor.u32 %v4421_v13, %v3998_v11  ;;  %1922 = vmatpush.bf16.msrb.mxu1 %v3743_v12 }
  0x3a   : > { %v3726_v16 = vld [vmem:[%s6441_s1 + $0x580] sm:$0xf]  ;;  %v4353_v17 = vld [vmem:[%s6441_s1 + $0x58c] sm:$0xf0]  ;;  %v3855_v23 = vor.u32 %v4385_v15, %v3854_v14  ;;  %1903 = vmatpush.bf16.msrb.mxu0 %v3615_v18  ;;  %v4267_v18 = vld [vmem:[%s6441_s1 + $0x2e4] sm:$0xf] }
  0x3b   : > { %v3598_v19 = vld [vmem:[%s6441_s1 + $0x480] sm:$0xf]  ;;  %v4321_v20 = vld [vmem:[%s6441_s1 + $0x48c] sm:$0xf0]  ;;  %v3727_v27 = vor.u32 %v4353_v17, %v3726_v16  ;;  %1960 = vmatpush.bf16.msrb.mxu3 %v3999_v22  ;;  %v4235_v22 = vld [vmem:[%s6441_s1 + $0x1e4] sm:$0xf] }
  0x3c   : > { %v3982_v21 = vld [vmem:[%s6441_s1 + $0x780] sm:$0xf]  ;;  %v4417_v24 = vld [vmem:[%s6441_s1 + $0x78c] sm:$0xf0]  ;;  %v3599_v35 = vor.u32 %v4321_v20, %v3598_v19  ;;  %1942 = vmatpush.bf16.msrb.mxu2 %v3855_v23  ;;  %v3392_v19 = vld [vmem:[%s6441_s1 + $0x2f0] sm:$0xf0] }
  0x3d   : > { %v247_v25 = vld [vmem:[%s4748_s16 + $0x80] sm:$0xff]  ;;  %v4381_v31 = vld [vmem:[%s6441_s1 + $0x66c] sm:$0xf0]  ;;  %v3983_v39 = vor.u32 %v4417_v24, %v3982_v21  ;;  %1923 = vmatpush.bf16.msrb.mxu1 %v3727_v27  ;;  %v3264_v23 = vld [vmem:[%s6441_s1 + $0x1f0] sm:$0xf0] }
  0x3e   : > { %v255_v26 = vld [vmem:[%s4748_s16 + $0xc0] sm:$0xff]  ;;  %v249_v32 = vld [vmem:[%s4748_s16 + $0x90] sm:$0xff]  ;;  %1904 = vmatpush.bf16.msrb.mxu0 %v3599_v35  ;;  %1857 = vmatmul.bf16.gmra.mxu1 %v4900_v50  ;;  %v3267_v38 = vor.u32 %v4235_v22, %v3264_v23 }
  0x3f   : > { %v3838_v30 = vld [vmem:[%s6441_s1 + $0x660] sm:$0xf]  ;;  %v4349_v34 = vld [vmem:[%s6441_s1 + $0x56c] sm:$0xf0]  ;;  %v4889_v44 = vpack.c.bf16 %v255_v26, %v247_v25  ;;  %1961 = vmatpush.bf16.msrb.mxu3 %v3983_v39  ;;  %v4203_v35 = vld [vmem:[%s6441_s1 + $0xe4] sm:$0xf] }
  0x40   : > { %v3710_v33 = vld [vmem:[%s6441_s1 + $0x560] sm:$0xf]  ;;  %v257_v36 = vld [vmem:[%s4748_s16 + $0xd0] sm:$0xff]  ;;  %v3839_v40 = vor.u32 %v4381_v31, %v3838_v30 }
  0x41   : > { %v3582_v41 = vld [vmem:[%s6441_s1 + $0x460] sm:$0xf]  ;;  %v4317_v42 = vld [vmem:[%s6441_s1 + $0x46c] sm:$0xf0]  ;;  %v3711_v45 = vor.u32 %v4349_v34, %v3710_v33  ;;  %v4902_v51 = vpack.c.bf16 %v257_v36, %v249_v32  ;;  %1895 = vmatmul.bf16.gmra.mxu3 %v4910_v56  ;;  %v236_v32 = vld [vmem:[%s4748_s16 + $0x28] sm:$0xff]  ;;  %v3395_v34 = vor.u32 %v4267_v18, %v3392_v19 }
  0x42   : > { %v3966_v43 = vld [vmem:[%s6441_s1 + $0x760] sm:$0xf]  ;;  %v4413_v46 = vld [vmem:[%s6441_s1 + $0x76c] sm:$0xf0]  ;;  %v3583_v58 = vor.u32 %v4317_v42, %v3582_v41  ;;  %1943 = vmatpush.bf16.msrb.mxu2 %v3839_v40  ;;  %1838 = vmatmul.bf16.gmra.mxu0 %v4889_v44  ;;  %v244_v33 = vld [vmem:[%s4748_s16 + $0x68] sm:$0xff] }
  0x43   : > { %v3822_v47 = vld [vmem:[%s6441_s1 + $0x640] sm:$0xf]  ;;  %v4377_v49 = vld [vmem:[%s6441_s1 + $0x64c] sm:$0xf0]  ;;  %v3967_v59 = vor.u32 %v4413_v46, %v3966_v43  ;;  %1924 = vmatpush.bf16.msrb.mxu1 %v3711_v45  ;;  %1876 = vmatmul.bf16.gmra.mxu2 %v4902_v51  ;;  %v3136_v36 = vld [vmem:[%s6441_s1 + $0xf0] sm:$0xf0] }
  0x44   : > { %v3694_v52 = vld [vmem:[%s6441_s1 + $0x540] sm:$0xf]  ;;  %v4345_v55 = vld [vmem:[%s6441_s1 + $0x54c] sm:$0xf0]  ;;  %v3823_v60 = vor.u32 %v4377_v49, %v3822_v47  ;;  %1905 = vmatpush.bf16.msrb.mxu0 %v3583_v58  ;;  %v3520_v39 = vld [vmem:[%s6441_s1 + $0x3f0] sm:$0xf0] }
  0x45   : > { %v3566_v61 = vld [vmem:[%s6441_s1 + $0x440] sm:$0xf]  ;;  %v4313_v62 = vld [vmem:[%s6441_s1 + $0x44c] sm:$0xf0]  ;;  %v3695_v0 = vor.u32 %v4345_v55, %v3694_v52  ;;  %1962 = vmatpush.bf16.msrb.mxu3 %v3967_v59  ;;  %v4263_v40 = vld [vmem:[%s6441_s1 + $0x2c4] sm:$0xf]  ;;  %v3139_v52 = vor.u32 %v4203_v35, %v3136_v36  ;;  %v3523_v59 = vor.u32 %v4299_v37, %v3520_v39 }
  0x46   : > { %v3950_v63 = vld [vmem:[%s6441_s1 + $0x740] sm:$0xf]  ;;  %v4409_v1 = vld [vmem:[%s6441_s1 + $0x74c] sm:$0xf0]  ;;  %v3567_v6 = vor.u32 %v4313_v62, %v3566_v61  ;;  %1944 = vmatpush.bf16.msrb.mxu2 %v3823_v60  ;;  %v3376_v41 = vld [vmem:[%s6441_s1 + $0x2d0] sm:$0xf0] }
  0x47   : > { %v3806_v2 = vld [vmem:[%s6441_s1 + $0x620] sm:$0xf]  ;;  %v4373_v3 = vld [vmem:[%s6441_s1 + $0x62c] sm:$0xf0]  ;;  %v3951_v8 = vor.u32 %v4409_v1, %v3950_v63  ;;  %1925 = vmatpush.bf16.msrb.mxu1 %v3695_v0  ;;  %v238_v46 = vld [vmem:[%s4748_s16 + $0x38] sm:$0xff]  ;;  %v3379_v60 = vor.u32 %v4263_v40, %v3376_v41  ;;  %v5031_v1 = vpack.c.bf16 %v244_v33, %v236_v32 }
  0x48   : > { %v3678_v4 = vld [vmem:[%s6441_s1 + $0x520] sm:$0xf]  ;;  %v4341_v5 = vld [vmem:[%s6441_s1 + $0x52c] sm:$0xf0]  ;;  %v3807_v9 = vor.u32 %v4373_v3, %v3806_v2  ;;  %1906 = vmatpush.bf16.msrb.mxu0 %v3567_v6  ;;  %v246_v49 = vld [vmem:[%s4748_s16 + $0x78] sm:$0xff] }
  0x49   : > { %v3550_v7 = vld [vmem:[%s6441_s1 + $0x420] sm:$0xf]  ;;  %v4309_v10 = vld [vmem:[%s6441_s1 + $0x42c] sm:$0xf0]  ;;  %v3679_v13 = vor.u32 %v4341_v5, %v3678_v4  ;;  %1963 = vmatpush.bf16.msrb.mxu3 %v3951_v8  ;;  %v4199_v55 = vld [vmem:[%s6441_s1 + $0xc4] sm:$0xf]  ;;  %v5044_v6 = vpack.c.bf16 %v246_v49, %v238_v46 }
  0x4a   : > { %v3934_v11 = vld [vmem:[%s6441_s1 + $0x720] sm:$0xf]  ;;  %v4405_v12 = vld [vmem:[%s6441_s1 + $0x72c] sm:$0xf0]  ;;  %v3551_v20 = vor.u32 %v4309_v10, %v3550_v7  ;;  %1945 = vmatpush.bf16.msrb.mxu2 %v3807_v9  ;;  %v3120_v58 = vld [vmem:[%s6441_s1 + $0xd0] sm:$0xf0] }
  0x4b   : > { %v3790_v14 = vld [vmem:[%s6441_s1 + $0x600] sm:$0xf]  ;;  %v4369_v15 = vld [vmem:[%s6441_s1 + $0x60c] sm:$0xf0]  ;;  %v3935_v24 = vor.u32 %v4405_v12, %v3934_v11  ;;  %1926 = vmatpush.bf16.msrb.mxu1 %v3679_v13  ;;  %v4231_v61 = vld [vmem:[%s6441_s1 + $0x1c4] sm:$0xf]  ;;  %v3123_v7 = vor.u32 %v4199_v55, %v3120_v58 }
  0x4c   : > { %v3662_v16 = vld [vmem:[%s6441_s1 + $0x500] sm:$0xf]  ;;  %v4337_v17 = vld [vmem:[%s6441_s1 + $0x50c] sm:$0xf0]  ;;  %v3791_v25 = vor.u32 %v4369_v15, %v3790_v14  ;;  %1907 = vmatpush.bf16.msrb.mxu0 %v3551_v20  ;;  %v3248_v62 = vld [vmem:[%s6441_s1 + $0x1d0] sm:$0xf0] }
  0x4d   : > { %v3534_v21 = vld [vmem:[%s6441_s1 + $0x400] sm:$0xf]  ;;  %v4305_v26 = vld [vmem:[%s6441_s1 + $0x40c] sm:$0xf0]  ;;  %v3663_v29 = vor.u32 %v4337_v17, %v3662_v16  ;;  %1964 = vmatpush.bf16.msrb.mxu3 %v3935_v24  ;;  %v4295_v63 = vld [vmem:[%s6441_s1 + $0x3c4] sm:$0xf]  ;;  %v3251_v8 = vor.u32 %v4231_v61, %v3248_v62 }
  0x4e   : > { %v3918_v27 = vld [vmem:[%s6441_s1 + $0x700] sm:$0xf]  ;;  %v4401_v28 = vld [vmem:[%s6441_s1 + $0x70c] sm:$0xf0]  ;;  %v3535_v42 = vor.u32 %v4305_v26, %v3534_v21  ;;  %1946 = vmatpush.bf16.msrb.mxu2 %v3791_v25  ;;  %v3504_v2 = vld [vmem:[%s6441_s1 + $0x3d0] sm:$0xf0] }
  0x4f   : > { %v235_v30 = vld [vmem:[%s4748_s16 + $0x20] sm:$0xff]  ;;  %v237_v43 = vld [vmem:[%s4748_s16 + $0x30] sm:$0xff]  ;;  %v3919_v47 = vor.u32 %v4401_v28, %v3918_v27  ;;  %1927 = vmatpush.bf16.msrb.mxu1 %v3663_v29  ;;  %v3507_v11 = vor.u32 %v4295_v63, %v3504_v2  ;;  %v260_v39 = vld [vmem:[%s4748_s16 + $0xe8] sm:$0xff] }
  0x50   : > { %v243_v31 = vld [vmem:[%s4748_s16 + $0x60] sm:$0xff]  ;;  %v245_v45 = vld [vmem:[%s4748_s16 + $0x70] sm:$0xff]  ;;  %1908 = vmatpush.bf16.msrb.mxu0 %v3535_v42  ;;  %v254_v55 = vld [vmem:[%s4748_s16 + $0xb8] sm:$0xff] }
  0x51   : > { %v5029_v0 = vpack.c.bf16 %v243_v31, %v235_v30  ;;  %v4259_v3 = vld [vmem:[%s6441_s1 + $0x2a4] sm:$0xf]  ;;  %v3360_v4 = vld [vmem:[%s6441_s1 + $0x2b0] sm:$0xf0]  ;;  %v5042_v5 = vpack.c.bf16 %v245_v45, %v237_v43  ;;  %1965 = vmatpush.bf16.msrb.mxu3 %v3919_v47  ;;  %v262_v58 = vld [vmem:[%s4748_s16 + $0xf8] sm:$0xff] }
  0x52   : > { %2015 = vmatpush.bf16.msra.mxu2 %v3395_v34  ;;  %v4195_v9 = vld [vmem:[%s6441_s1 + $0xa4] sm:$0xf]  ;;  %v3104_v10 = vld [vmem:[%s6441_s1 + $0xb0] sm:$0xf0]  ;;  %v3363_v12 = vor.u32 %v4259_v3, %v3360_v4  ;;  %1928 = vmatmul.bf16.vlgmr.msrb.gmra.mxu1 %v5031_v1 }
  0x53   : > { %1996 = vmatpush.bf16.msra.mxu1 %v3267_v38  ;;  %v4227_v13 = vld [vmem:[%s6441_s1 + $0x1a4] sm:$0xf]  ;;  %v3232_v14 = vld [vmem:[%s6441_s1 + $0x1b0] sm:$0xf0]  ;;  %1909 = vmatmul.bf16.vlgmr.msrb.gmra.mxu0 %v5029_v0  ;;  %v3107_v19 = vor.u32 %v4195_v9, %v3104_v10  ;;  %v252_v38 = vld [vmem:[%s4748_s16 + $0xa8] sm:$0xff] }
  0x54   : > { %1977 = vmatpush.bf16.msra.mxu0 %v3139_v52  ;;  %v4291_v15 = vld [vmem:[%s6441_s1 + $0x3a4] sm:$0xf]  ;;  %v3488_v16 = vld [vmem:[%s6441_s1 + $0x3b0] sm:$0xf0]  ;;  %1947 = vmatmul.bf16.vlgmr.msrb.gmra.mxu2 %v5042_v5  ;;  %v3235_v20 = vor.u32 %v4227_v13, %v3232_v14  ;;  %v5147_v9 = vpack.c.bf16 %v260_v39, %v252_v38  ;;  %v5160_v14 = vpack.c.bf16 %v262_v58, %v254_v55 }
  0x55   : > { %2034 = vmatpush.bf16.msra.mxu3 %v3523_v59  ;;  %v4255_v17 = vld [vmem:[%s6441_s1 + $0x284] sm:$0xf]  ;;  %v3344_v18 = vld [vmem:[%s6441_s1 + $0x290] sm:$0xf0]  ;;  %v3491_v23 = vor.u32 %v4291_v15, %v3488_v16 }
  0x56   : > { %2016 = vmatpush.bf16.msra.mxu2 %v3379_v60  ;;  %1966 = vmatmul.bf16.vlgmr.msrb.gmra.mxu3 %v5044_v6  ;;  %v4191_v21 = vld [vmem:[%s6441_s1 + $0x84] sm:$0xf]  ;;  %v3088_v22 = vld [vmem:[%s6441_s1 + $0x90] sm:$0xf0]  ;;  %v3347_v24 = vor.u32 %v4255_v17, %v3344_v18 }
  0x57   : > { %1997 = vmatpush.bf16.msra.mxu1 %v3251_v8  ;;  %v4223_v25 = vld [vmem:[%s6441_s1 + $0x184] sm:$0xf]  ;;  %v3216_v26 = vld [vmem:[%s6441_s1 + $0x190] sm:$0xf0]  ;;  %v3091_v31 = vor.u32 %v4191_v21, %v3088_v22 }
  0x58   : > { %1978 = vmatpush.bf16.msra.mxu0 %v3123_v7  ;;  %v4287_v27 = vld [vmem:[%s6441_s1 + $0x384] sm:$0xf]  ;;  %v3472_v28 = vld [vmem:[%s6441_s1 + $0x390] sm:$0xf0]  ;;  %v3219_v32 = vor.u32 %v4223_v25, %v3216_v26 }
  0x59   : > { %2035 = vmatpush.bf16.msra.mxu3 %v3507_v11  ;;  %v4251_v29 = vld [vmem:[%s6441_s1 + $0x264] sm:$0xf]  ;;  %v3328_v30 = vld [vmem:[%s6441_s1 + $0x270] sm:$0xf0]  ;;  %v3475_v35 = vor.u32 %v4287_v27, %v3472_v28 }
  0x5a   : > { %2017 = vmatpush.bf16.msra.mxu2 %v3363_v12  ;;  %v4187_v33 = vld [vmem:[%s6441_s1 + $0x64] sm:$0xf]  ;;  %v3072_v34 = vld [vmem:[%s6441_s1 + $0x70] sm:$0xf0]  ;;  %v3331_v40 = vor.u32 %v4251_v29, %v3328_v30 }
  0x5b   : > { %1998 = vmatpush.bf16.msra.mxu1 %v3235_v20  ;;  %v251_v36 = vld [vmem:[%s4748_s16 + $0xa0] sm:$0xff]  ;;  %v3200_v42 = vld [vmem:[%s6441_s1 + $0x170] sm:$0xf0]  ;;  %v3075_v59 = vor.u32 %v4187_v33, %v3072_v34 }
  0x5c   : > { %1979 = vmatpush.bf16.msra.mxu0 %v3107_v19  ;;  %v259_v37 = vld [vmem:[%s4748_s16 + $0xe0] sm:$0xff]  ;;  %v3456_v45 = vld [vmem:[%s6441_s1 + $0x370] sm:$0xf0] }
  0x5d   : > { %2036 = vmatpush.bf16.msra.mxu3 %v3491_v23  ;;  %v4219_v41 = vld [vmem:[%s6441_s1 + $0x164] sm:$0xf]  ;;  %v3312_v47 = vld [vmem:[%s6441_s1 + $0x250] sm:$0xf0]  ;;  %v5145_v8 = vpack.c.bf16 %v259_v37, %v251_v36 }
  0x5e   : > { %2018 = vmatpush.bf16.msra.mxu2 %v3347_v24  ;;  %v4283_v43 = vld [vmem:[%s6441_s1 + $0x364] sm:$0xf]  ;;  %v253_v49 = vld [vmem:[%s4748_s16 + $0xb0] sm:$0xff]  ;;  %v3203_v60 = vor.u32 %v4219_v41, %v3200_v42 }
  0x5f   : > { %v4247_v46 = vld [vmem:[%s6441_s1 + $0x244] sm:$0xf]  ;;  %v261_v52 = vld [vmem:[%s4748_s16 + $0xf0] sm:$0xff]  ;;  %1999 = vmatpush.bf16.msra.mxu1 %v3219_v32  ;;  %v3459_v63 = vor.u32 %v4283_v43, %v3456_v45 }
  0x60   : > { %1980 = vmatpush.bf16.msra.mxu0 %v3091_v31  ;;  %v4183_v61 = vld [vmem:[%s6441_s1 + $0x44] sm:$0xf]  ;;  %v3056_v62 = vld [vmem:[%s6441_s1 + $0x50] sm:$0xf0]  ;;  %v3315_v2 = vor.u32 %v4247_v46, %v3312_v47  ;;  %v5158_v13 = vpack.c.bf16 %v261_v52, %v253_v49 }
  0x61   : > { %2037 = vmatpush.bf16.msra.mxu3 %v3475_v35  ;;  %v4215_v3 = vld [vmem:[%s6441_s1 + $0x144] sm:$0xf]  ;;  %v3184_v4 = vld [vmem:[%s6441_s1 + $0x150] sm:$0xf0]  ;;  %v3059_v15 = vor.u32 %v4183_v61, %v3056_v62 }
  0x62   : > { %2019 = vmatpush.bf16.msra.mxu2 %v3331_v40  ;;  %v4279_v7 = vld [vmem:[%s6441_s1 + $0x344] sm:$0xf]  ;;  %v3440_v10 = vld [vmem:[%s6441_s1 + $0x350] sm:$0xf0]  ;;  %v3187_v16 = vor.u32 %v4215_v3, %v3184_v4  ;;  %1933 = vmatmul.bf16.gmra.mxu1 %v5147_v9 }
  0x63   : > { %v4243_v11 = vld [vmem:[%s6441_s1 + $0x224] sm:$0xf]  ;;  %v3296_v12 = vld [vmem:[%s6441_s1 + $0x230] sm:$0xf0]  ;;  %2000 = vmatpush.bf16.msra.mxu1 %v3203_v60  ;;  %v3443_v19 = vor.u32 %v4279_v7, %v3440_v10  ;;  %1914 = vmatmul.bf16.gmra.mxu0 %v5145_v8 }
  0x64   : > { %1981 = vmatpush.bf16.msra.mxu0 %v3075_v59  ;;  %v4179_v17 = vld [vmem:[%s6441_s1 + $0x24] sm:$0xf]  ;;  %v3040_v18 = vld [vmem:[%s6441_s1 + $0x30] sm:$0xf0]  ;;  %v3299_v20 = vor.u32 %v4243_v11, %v3296_v12  ;;  %1952 = vmatmul.bf16.gmra.mxu2 %v5158_v13 }
  0x65   : > { %2038 = vmatpush.bf16.msra.mxu3 %v3459_v63  ;;  %v4211_v21 = vld [vmem:[%s6441_s1 + $0x124] sm:$0xf]  ;;  %v3168_v22 = vld [vmem:[%s6441_s1 + $0x130] sm:$0xf0]  ;;  %v3043_v29 = vor.u32 %v4179_v17, %v3040_v18 }
  0x66   : > { %2020 = vmatpush.bf16.msra.mxu2 %v3315_v2  ;;  %v4275_v23 = vld [vmem:[%s6441_s1 + $0x324] sm:$0xf]  ;;  %v3424_v24 = vld [vmem:[%s6441_s1 + $0x330] sm:$0xf0]  ;;  %1971 = vmatmul.bf16.gmra.mxu3 %v5160_v14  ;;  %v3171_v30 = vor.u32 %v4211_v21, %v3168_v22 }
  0x67   : > { %v4239_v25 = vld [vmem:[%s6441_s1 + $0x204] sm:$0xf]  ;;  %v3280_v26 = vld [vmem:[%s6441_s1 + $0x210] sm:$0xf0]  ;;  %2001 = vmatpush.bf16.msra.mxu1 %v3187_v16  ;;  %v3427_v34 = vor.u32 %v4275_v23, %v3424_v24 }
  0x68   : > { %v4395_v27 = vld [vmem:[%s6441_s1 + $0x6e4] sm:$0xf]  ;;  %v3904_v28 = vld [vmem:[%s6441_s1 + $0x6f0] sm:$0xf0]  ;;  %1982 = vmatpush.bf16.msra.mxu0 %v3059_v15  ;;  %v3283_v35 = vor.u32 %v4239_v25, %v3280_v26 }
  0x69   : > { %v4175_v31 = vld [vmem:[%s6441_s1 + $0x4] sm:$0xf]  ;;  %v3024_v32 = vld [vmem:[%s6441_s1 + $0x10] sm:$0xf0]  ;;  %2039 = vmatpush.bf16.msra.mxu3 %v3443_v19  ;;  %v3907_v39 = vor.u32 %v4395_v27, %v3904_v28 }
  0x6a   : > { %v4207_v33 = vld [vmem:[%s6441_s1 + $0x104] sm:$0xf]  ;;  %2021 = vmatpush.bf16.msra.mxu2 %v3299_v20  ;;  %v3152_v36 = vld [vmem:[%s6441_s1 + $0x110] sm:$0xf0]  ;;  %v3027_v47 = vor.u32 %v4175_v31, %v3024_v32 }
  0x6b   : > { %v4271_v37 = vld [vmem:[%s6441_s1 + $0x304] sm:$0xf]  ;;  %v3408_v38 = vld [vmem:[%s6441_s1 + $0x310] sm:$0xf0]  ;;  %2002 = vmatpush.bf16.msra.mxu1 %v3171_v30  ;;  %v3155_v49 = vor.u32 %v4207_v33, %v3152_v36 }
  0x6c   : > { %v4331_v40 = vld [vmem:[%s6441_s1 + $0x4e4] sm:$0xf]  ;;  %v3648_v41 = vld [vmem:[%s6441_s1 + $0x4f0] sm:$0xf0]  ;;  %1983 = vmatpush.bf16.msra.mxu0 %v3043_v29  ;;  %v3411_v58 = vor.u32 %v4271_v37, %v3408_v38 }
  0x6d   : > { %v4363_v42 = vld [vmem:[%s6441_s1 + $0x5e4] sm:$0xf]  ;;  %v3776_v43 = vld [vmem:[%s6441_s1 + $0x5f0] sm:$0xf0]  ;;  %2040 = vmatpush.bf16.msra.mxu3 %v3427_v34  ;;  %v3651_v59 = vor.u32 %v4331_v40, %v3648_v41 }
  0x6e   : > { %v4427_v45 = vld [vmem:[%s6441_s1 + $0x7e4] sm:$0xf]  ;;  %v4032_v46 = vld [vmem:[%s6441_s1 + $0x7f0] sm:$0xf0]  ;;  %2022 = vmatpush.bf16.msra.mxu2 %v3283_v35  ;;  %v3779_v60 = vor.u32 %v4363_v42, %v3776_v43 }
  0x6f   : > { %v4391_v52 = vld [vmem:[%s6441_s1 + $0x6c4] sm:$0xf]  ;;  %v3888_v55 = vld [vmem:[%s6441_s1 + $0x6d0] sm:$0xf0]  ;;  %v4035_v61 = vor.u32 %v4427_v45, %v4032_v46  ;;  %2003 = vmatpush.bf16.msra.mxu1 %v3155_v49 }
  0x70   : > { %v4327_v62 = vld [vmem:[%s6441_s1 + $0x4c4] sm:$0xf]  ;;  %v3632_v63 = vld [vmem:[%s6441_s1 + $0x4d0] sm:$0xf0]  ;;  %v3891_v2 = vor.u32 %v4391_v52, %v3888_v55  ;;  %1984 = vmatpush.bf16.msra.mxu0 %v3027_v47 }
  0x71   : > { %v4359_v3 = vld [vmem:[%s6441_s1 + $0x5c4] sm:$0xf]  ;;  %v3760_v4 = vld [vmem:[%s6441_s1 + $0x5d0] sm:$0xf0]  ;;  %2041 = vmatpush.bf16.msra.mxu3 %v3411_v58  ;;  %v3635_v7 = vor.u32 %v4327_v62, %v3632_v63 }
  0x72   : > { %2091 = vmatpush.bf16.msrb.mxu2 %v3907_v39  ;;  %v4423_v10 = vld [vmem:[%s6441_s1 + $0x7c4] sm:$0xf]  ;;  %v4016_v11 = vld [vmem:[%s6441_s1 + $0x7d0] sm:$0xf0]  ;;  %v3763_v18 = vor.u32 %v4359_v3, %v3760_v4  ;;  %2004 = vmatmul.bf16.vlgmr.msra.gmra.mxu1 %v4784_v53 }
  0x73   : > { %v4387_v12 = vld [vmem:[%s6441_s1 + $0x6a4] sm:$0xf]  ;;  %2072 = vmatpush.bf16.msrb.mxu1 %v3779_v60  ;;  %v3872_v15 = vld [vmem:[%s6441_s1 + $0x6b0] sm:$0xf0]  ;;  %v4019_v19 = vor.u32 %v4423_v10, %v4016_v11  ;;  %1985 = vmatmul.bf16.vlgmr.msra.gmra.mxu0 %v4777_v48 }
  0x74   : > { %2053 = vmatpush.bf16.msrb.mxu0 %v3651_v59  ;;  %v4323_v16 = vld [vmem:[%s6441_s1 + $0x4a4] sm:$0xf]  ;;  %v3616_v17 = vld [vmem:[%s6441_s1 + $0x4b0] sm:$0xf0]  ;;  %v3875_v22 = vor.u32 %v4387_v12, %v3872_v15  ;;  %2023 = vmatmul.bf16.vlgmr.msra.gmra.mxu2 %v4786_v54 }
  0x75   : > { %2110 = vmatpush.bf16.msrb.mxu3 %v4035_v61  ;;  %v4355_v20 = vld [vmem:[%s6441_s1 + $0x5a4] sm:$0xf]  ;;  %v3744_v21 = vld [vmem:[%s6441_s1 + $0x5b0] sm:$0xf0]  ;;  %v3619_v23 = vor.u32 %v4323_v16, %v3616_v17 }
  0x76   : > { %2092 = vmatpush.bf16.msrb.mxu2 %v3891_v2  ;;  %v4419_v24 = vld [vmem:[%s6441_s1 + $0x7a4] sm:$0xf]  ;;  %v4000_v25 = vld [vmem:[%s6441_s1 + $0x7b0] sm:$0xf0]  ;;  %2042 = vmatmul.bf16.vlgmr.msra.gmra.mxu3 %v4794_v57  ;;  %v3747_v30 = vor.u32 %v4355_v20, %v3744_v21 }
  0x77   : > { %v4383_v26 = vld [vmem:[%s6441_s1 + $0x684] sm:$0xf]  ;;  %v3856_v27 = vld [vmem:[%s6441_s1 + $0x690] sm:$0xf0]  ;;  %2073 = vmatpush.bf16.msrb.mxu1 %v3763_v18  ;;  %v4003_v31 = vor.u32 %v4419_v24, %v4000_v25 }
  0x78   : > { %2054 = vmatpush.bf16.msrb.mxu0 %v3635_v7  ;;  %v4319_v28 = vld [vmem:[%s6441_s1 + $0x484] sm:$0xf]  ;;  %v3600_v29 = vld [vmem:[%s6441_s1 + $0x490] sm:$0xf0]  ;;  %v3859_v34 = vor.u32 %v4383_v26, %v3856_v27 }
  0x79   : > { %2111 = vmatpush.bf16.msrb.mxu3 %v4019_v19  ;;  %v4351_v32 = vld [vmem:[%s6441_s1 + $0x584] sm:$0xf]  ;;  %v3728_v33 = vld [vmem:[%s6441_s1 + $0x590] sm:$0xf0]  ;;  %v3603_v35 = vor.u32 %v4319_v28, %v3600_v29 }
  0x7a   : > { %2093 = vmatpush.bf16.msrb.mxu2 %v3875_v22  ;;  %v4415_v36 = vld [vmem:[%s6441_s1 + $0x784] sm:$0xf]  ;;  %v3984_v37 = vld [vmem:[%s6441_s1 + $0x790] sm:$0xf0]  ;;  %v3731_v42 = vor.u32 %v4351_v32, %v3728_v33  ;;  %v3142_v32 = vld [vmem:[%s6441_s1 + $0xe8] sm:$0xf] }
  0x7b   : > { %v4379_v38 = vld [vmem:[%s6441_s1 + $0x664] sm:$0xf]  ;;  %v3840_v39 = vld [vmem:[%s6441_s1 + $0x670] sm:$0xf0]  ;;  %2074 = vmatpush.bf16.msrb.mxu1 %v3747_v30  ;;  %v3987_v43 = vor.u32 %v4415_v36, %v3984_v37  ;;  %v3398_v30 = vld [vmem:[%s6441_s1 + $0x2e8] sm:$0xf] }
  0x7c   : > { %2055 = vmatpush.bf16.msrb.mxu0 %v3619_v23  ;;  %v4315_v40 = vld [vmem:[%s6441_s1 + $0x464] sm:$0xf]  ;;  %v3584_v41 = vld [vmem:[%s6441_s1 + $0x470] sm:$0xf0]  ;;  %v3843_v47 = vor.u32 %v4379_v38, %v3840_v39  ;;  %v4206_v33 = vld [vmem:[%s6441_s1 + $0xf4] sm:$0xf0] }
  0x7d   : > { %2112 = vmatpush.bf16.msrb.mxu3 %v4003_v31  ;;  %v4347_v45 = vld [vmem:[%s6441_s1 + $0x564] sm:$0xf]  ;;  %v3712_v46 = vld [vmem:[%s6441_s1 + $0x570] sm:$0xf0]  ;;  %v3587_v49 = vor.u32 %v4315_v40, %v3584_v41  ;;  %v4270_v31 = vld [vmem:[%s6441_s1 + $0x2f4] sm:$0xf0] }
  0x7e   : > { %2094 = vmatpush.bf16.msrb.mxu2 %v3859_v34  ;;  %v4411_v52 = vld [vmem:[%s6441_s1 + $0x764] sm:$0xf]  ;;  %v3968_v55 = vld [vmem:[%s6441_s1 + $0x770] sm:$0xf0]  ;;  %v3715_v62 = vor.u32 %v4347_v45, %v3712_v46  ;;  %v3399_v45 = vor.u32 %v4270_v31, %v3398_v30  ;;  %v3143_v46 = vor.u32 %v4206_v33, %v3142_v32  ;;  %v3094_v30 = vld [vmem:[%s6441_s1 + $0x88] sm:$0xf] }
  0x7f   : > { %v4375_v58 = vld [vmem:[%s6441_s1 + $0x644] sm:$0xf]  ;;  %v3824_v59 = vld [vmem:[%s6441_s1 + $0x650] sm:$0xf0]  ;;  %2075 = vmatpush.bf16.msrb.mxu1 %v3731_v42  ;;  %v3971_v63 = vor.u32 %v4411_v52, %v3968_v55  ;;  %v3270_v42 = vld [vmem:[%s6441_s1 + $0x1e8] sm:$0xf] }
  0x80   : > { %2056 = vmatpush.bf16.msrb.mxu0 %v3603_v35  ;;  %v4311_v60 = vld [vmem:[%s6441_s1 + $0x444] sm:$0xf]  ;;  %v3568_v61 = vld [vmem:[%s6441_s1 + $0x450] sm:$0xf0]  ;;  %v3827_v4 = vor.u32 %v4375_v58, %v3824_v59  ;;  %v3382_v52 = vld [vmem:[%s6441_s1 + $0x2c8] sm:$0xf] }
  0x81   : > { %2113 = vmatpush.bf16.msrb.mxu3 %v3987_v43  ;;  %v4343_v2 = vld [vmem:[%s6441_s1 + $0x544] sm:$0xf]  ;;  %v3696_v3 = vld [vmem:[%s6441_s1 + $0x550] sm:$0xf0]  ;;  %v3571_v7 = vor.u32 %v4311_v60, %v3568_v61  ;;  %v4238_v43 = vld [vmem:[%s6441_s1 + $0x1f4] sm:$0xf0] }
  0x82   : > { %2095 = vmatpush.bf16.msrb.mxu2 %v3843_v47  ;;  %v4407_v10 = vld [vmem:[%s6441_s1 + $0x744] sm:$0xf]  ;;  %v3952_v11 = vld [vmem:[%s6441_s1 + $0x750] sm:$0xf0]  ;;  %v3699_v18 = vor.u32 %v4343_v2, %v3696_v3  ;;  %2009 = vmatmul.bf16.gmra.mxu1 %v4900_v50  ;;  %v3526_v47 = vld [vmem:[%s6441_s1 + $0x3e8] sm:$0xf] }
  0x83   : > { %v4371_v12 = vld [vmem:[%s6441_s1 + $0x624] sm:$0xf]  ;;  %v3808_v15 = vld [vmem:[%s6441_s1 + $0x630] sm:$0xf0]  ;;  %2076 = vmatpush.bf16.msrb.mxu1 %v3715_v62  ;;  %v3955_v19 = vor.u32 %v4407_v10, %v3952_v11  ;;  %1990 = vmatmul.bf16.gmra.mxu0 %v4889_v44  ;;  %v4266_v55 = vld [vmem:[%s6441_s1 + $0x2d4] sm:$0xf0]  ;;  %v3271_v62 = vor.u32 %v4238_v43, %v3270_v42 }
  0x84   : > { %2057 = vmatpush.bf16.msrb.mxu0 %v3587_v49  ;;  %v4307_v16 = vld [vmem:[%s6441_s1 + $0x424] sm:$0xf]  ;;  %v3552_v17 = vld [vmem:[%s6441_s1 + $0x430] sm:$0xf0]  ;;  %v3811_v23 = vor.u32 %v4371_v12, %v3808_v15  ;;  %2028 = vmatmul.bf16.gmra.mxu2 %v4902_v51  ;;  %v4302_v49 = vld [vmem:[%s6441_s1 + $0x3f4] sm:$0xf0]  ;;  %v3383_v3 = vor.u32 %v4266_v55, %v3382_v52 }
  0x85   : > { %2114 = vmatpush.bf16.msrb.mxu3 %v3971_v63  ;;  %v4339_v20 = vld [vmem:[%s6441_s1 + $0x524] sm:$0xf]  ;;  %v3680_v21 = vld [vmem:[%s6441_s1 + $0x530] sm:$0xf0]  ;;  %v3555_v24 = vor.u32 %v4307_v16, %v3552_v17  ;;  %v3126_v58 = vld [vmem:[%s6441_s1 + $0xc8] sm:$0xf]  ;;  %v3527_v63 = vor.u32 %v4302_v49, %v3526_v47 }
  0x86   : > { %v4403_v22 = vld [vmem:[%s6441_s1 + $0x724] sm:$0xf]  ;;  %2096 = vmatpush.bf16.msrb.mxu2 %v3827_v4  ;;  %v3936_v25 = vld [vmem:[%s6441_s1 + $0x730] sm:$0xf0]  ;;  %2047 = vmatmul.bf16.gmra.mxu3 %v4910_v56  ;;  %v3683_v34 = vor.u32 %v4339_v20, %v3680_v21  ;;  %v4202_v59 = vld [vmem:[%s6441_s1 + $0xd4] sm:$0xf0] }
  0x87   : > { %v4367_v26 = vld [vmem:[%s6441_s1 + $0x604] sm:$0xf]  ;;  %v3792_v27 = vld [vmem:[%s6441_s1 + $0x610] sm:$0xf0]  ;;  %2077 = vmatpush.bf16.msrb.mxu1 %v3699_v18  ;;  %v3939_v35 = vor.u32 %v4403_v22, %v3936_v25  ;;  %v3254_v2 = vld [vmem:[%s6441_s1 + $0x1c8] sm:$0xf]  ;;  %v3127_v4 = vor.u32 %v4202_v59, %v3126_v58 }
  0x88   : > { %2058 = vmatpush.bf16.msrb.mxu0 %v3571_v7  ;;  %v4303_v28 = vld [vmem:[%s6441_s1 + $0x404] sm:$0xf]  ;;  %v3536_v29 = vld [vmem:[%s6441_s1 + $0x410] sm:$0xf0]  ;;  %v3795_v39 = vor.u32 %v4367_v26, %v3792_v27  ;;  %v4234_v7 = vld [vmem:[%s6441_s1 + $0x1d4] sm:$0xf0] }
  0x89   : > { %2115 = vmatpush.bf16.msrb.mxu3 %v3955_v19  ;;  %v4335_v36 = vld [vmem:[%s6441_s1 + $0x504] sm:$0xf]  ;;  %v3664_v37 = vld [vmem:[%s6441_s1 + $0x510] sm:$0xf0]  ;;  %v3539_v40 = vor.u32 %v4303_v28, %v3536_v29  ;;  %v3510_v10 = vld [vmem:[%s6441_s1 + $0x3c8] sm:$0xf]  ;;  %v3255_v16 = vor.u32 %v4234_v7, %v3254_v2 }
  0x8a   : > { %v4399_v38 = vld [vmem:[%s6441_s1 + $0x704] sm:$0xf]  ;;  %2097 = vmatpush.bf16.msrb.mxu2 %v3811_v23  ;;  %v3920_v41 = vld [vmem:[%s6441_s1 + $0x710] sm:$0xf0]  ;;  %v3667_v60 = vor.u32 %v4335_v36, %v3664_v37  ;;  %v4298_v11 = vld [vmem:[%s6441_s1 + $0x3d4] sm:$0xf0] }
  0x8b   : > { %2078 = vmatpush.bf16.msrb.mxu1 %v3683_v34  ;;  %v3923_v61 = vor.u32 %v4399_v38, %v3920_v41  ;;  %v3366_v12 = vld [vmem:[%s6441_s1 + $0x2a8] sm:$0xf]  ;;  %v4262_v15 = vld [vmem:[%s6441_s1 + $0x2b4] sm:$0xf0]  ;;  %v3511_v17 = vor.u32 %v4298_v11, %v3510_v10 }
  0x8c   : > { %2059 = vmatpush.bf16.msrb.mxu0 %v3555_v24  ;;  %v3110_v18 = vld [vmem:[%s6441_s1 + $0xa8] sm:$0xf]  ;;  %v4198_v19 = vld [vmem:[%s6441_s1 + $0xb4] sm:$0xf0]  ;;  %v3367_v24 = vor.u32 %v4262_v15, %v3366_v12 }
  0x8d   : > { %2116 = vmatpush.bf16.msrb.mxu3 %v3939_v35  ;;  %v3238_v20 = vld [vmem:[%s6441_s1 + $0x1a8] sm:$0xf]  ;;  %v4230_v21 = vld [vmem:[%s6441_s1 + $0x1b4] sm:$0xf0]  ;;  %v3111_v25 = vor.u32 %v4198_v19, %v3110_v18 }
  0x8e   : > { %2098 = vmatpush.bf16.msrb.mxu2 %v3795_v39  ;;  %v3494_v22 = vld [vmem:[%s6441_s1 + $0x3a8] sm:$0xf]  ;;  %v4294_v23 = vld [vmem:[%s6441_s1 + $0x3b4] sm:$0xf0]  ;;  %v3239_v28 = vor.u32 %v4230_v21, %v3238_v20 }
  0x8f   : > { %2079 = vmatpush.bf16.msrb.mxu1 %v3667_v60  ;;  %v3350_v26 = vld [vmem:[%s6441_s1 + $0x288] sm:$0xf]  ;;  %v4258_v27 = vld [vmem:[%s6441_s1 + $0x294] sm:$0xf0]  ;;  %v3495_v29 = vor.u32 %v4294_v23, %v3494_v22 }
  0x90   : > { %2060 = vmatpush.bf16.msrb.mxu0 %v3539_v40  ;;  %v4194_v31 = vld [vmem:[%s6441_s1 + $0x94] sm:$0xf0]  ;;  %v3222_v32 = vld [vmem:[%s6441_s1 + $0x188] sm:$0xf]  ;;  %v3351_v36 = vor.u32 %v4258_v27, %v3350_v26 }
  0x91   : > { %2117 = vmatpush.bf16.msrb.mxu3 %v3923_v61  ;;  %v4226_v33 = vld [vmem:[%s6441_s1 + $0x194] sm:$0xf0]  ;;  %v3478_v34 = vld [vmem:[%s6441_s1 + $0x388] sm:$0xf]  ;;  %v3095_v37 = vor.u32 %v4194_v31, %v3094_v30 }
  0x92   : > { %2167 = vmatpush.bf16.msra.mxu2 %v3399_v45  ;;  %2080 = vmatmul.bf16.vlgmr.msrb.gmra.mxu1 %v5031_v1  ;;  %v4290_v35 = vld [vmem:[%s6441_s1 + $0x394] sm:$0xf0]  ;;  %v3334_v38 = vld [vmem:[%s6441_s1 + $0x268] sm:$0xf]  ;;  %v3223_v40 = vor.u32 %v4226_v33, %v3222_v32 }
  0x93   : > { %2148 = vmatpush.bf16.msra.mxu1 %v3271_v62  ;;  %2061 = vmatmul.bf16.vlgmr.msrb.gmra.mxu0 %v5029_v0  ;;  %v4254_v39 = vld [vmem:[%s6441_s1 + $0x274] sm:$0xf0]  ;;  %v3479_v41 = vor.u32 %v4290_v35, %v3478_v34  ;;  %v3078_v42 = vld [vmem:[%s6441_s1 + $0x68] sm:$0xf] }
  0x94   : > { %2129 = vmatpush.bf16.msra.mxu0 %v3143_v46  ;;  %2099 = vmatmul.bf16.vlgmr.msrb.gmra.mxu2 %v5042_v5  ;;  %v4190_v43 = vld [vmem:[%s6441_s1 + $0x74] sm:$0xf0]  ;;  %v3206_v45 = vld [vmem:[%s6441_s1 + $0x168] sm:$0xf]  ;;  %v3335_v52 = vor.u32 %v4254_v39, %v3334_v38 }
  0x95   : > { %2186 = vmatpush.bf16.msra.mxu3 %v3527_v63  ;;  %v4222_v46 = vld [vmem:[%s6441_s1 + $0x174] sm:$0xf0]  ;;  %v3462_v47 = vld [vmem:[%s6441_s1 + $0x368] sm:$0xf]  ;;  %v3079_v55 = vor.u32 %v4190_v43, %v3078_v42 }
  0x96   : > { %2168 = vmatpush.bf16.msra.mxu2 %v3383_v3  ;;  %2118 = vmatmul.bf16.vlgmr.msrb.gmra.mxu3 %v5044_v6  ;;  %v4286_v49 = vld [vmem:[%s6441_s1 + $0x374] sm:$0xf0]  ;;  %v3318_v58 = vld [vmem:[%s6441_s1 + $0x248] sm:$0xf]  ;;  %v3207_v60 = vor.u32 %v4222_v46, %v3206_v45 }
  0x97   : > { %2149 = vmatpush.bf16.msra.mxu1 %v3255_v16  ;;  %v4250_v59 = vld [vmem:[%s6441_s1 + $0x254] sm:$0xf0]  ;;  %v3463_v61 = vor.u32 %v4286_v49, %v3462_v47  ;;  %v3062_v62 = vld [vmem:[%s6441_s1 + $0x48] sm:$0xf] }
  0x98   : > { %2130 = vmatpush.bf16.msra.mxu0 %v3127_v4  ;;  %v4186_v63 = vld [vmem:[%s6441_s1 + $0x54] sm:$0xf0]  ;;  %v3190_v2 = vld [vmem:[%s6441_s1 + $0x148] sm:$0xf]  ;;  %v3319_v10 = vor.u32 %v4250_v59, %v3318_v58 }
  0x99   : > { %2187 = vmatpush.bf16.msra.mxu3 %v3511_v17  ;;  %v4218_v3 = vld [vmem:[%s6441_s1 + $0x154] sm:$0xf0]  ;;  %v3446_v4 = vld [vmem:[%s6441_s1 + $0x348] sm:$0xf]  ;;  %v3063_v11 = vor.u32 %v4186_v63, %v3062_v62 }
  0x9a   : > { %2169 = vmatpush.bf16.msra.mxu2 %v3367_v24  ;;  %v4282_v7 = vld [vmem:[%s6441_s1 + $0x354] sm:$0xf0]  ;;  %v3302_v12 = vld [vmem:[%s6441_s1 + $0x228] sm:$0xf]  ;;  %v3191_v16 = vor.u32 %v4218_v3, %v3190_v2 }
  0x9b   : > { %2150 = vmatpush.bf16.msra.mxu1 %v3239_v28  ;;  %v4246_v15 = vld [vmem:[%s6441_s1 + $0x234] sm:$0xf0]  ;;  %v3447_v17 = vor.u32 %v4282_v7, %v3446_v4  ;;  %v3046_v18 = vld [vmem:[%s6441_s1 + $0x28] sm:$0xf] }
  0x9c   : > { %2131 = vmatpush.bf16.msra.mxu0 %v3111_v25  ;;  %v4182_v19 = vld [vmem:[%s6441_s1 + $0x34] sm:$0xf0]  ;;  %v3174_v20 = vld [vmem:[%s6441_s1 + $0x128] sm:$0xf]  ;;  %v3303_v25 = vor.u32 %v4246_v15, %v3302_v12 }
  0x9d   : > { %2188 = vmatpush.bf16.msra.mxu3 %v3495_v29  ;;  %v4214_v21 = vld [vmem:[%s6441_s1 + $0x134] sm:$0xf0]  ;;  %v3430_v22 = vld [vmem:[%s6441_s1 + $0x328] sm:$0xf]  ;;  %v3047_v26 = vor.u32 %v4182_v19, %v3046_v18 }
  0x9e   : > { %2170 = vmatpush.bf16.msra.mxu2 %v3351_v36  ;;  %v4278_v23 = vld [vmem:[%s6441_s1 + $0x334] sm:$0xf0]  ;;  %v3286_v24 = vld [vmem:[%s6441_s1 + $0x208] sm:$0xf]  ;;  %v3175_v30 = vor.u32 %v4214_v21, %v3174_v20 }
  0x9f   : > { %2151 = vmatpush.bf16.msra.mxu1 %v3223_v40  ;;  %v4242_v27 = vld [vmem:[%s6441_s1 + $0x214] sm:$0xf0]  ;;  %v3030_v28 = vld [vmem:[%s6441_s1 + $0x8] sm:$0xf]  ;;  %v3431_v31 = vor.u32 %v4278_v23, %v3430_v22 }
  0xa0   : > { %2132 = vmatpush.bf16.msra.mxu0 %v3095_v37  ;;  %v4178_v29 = vld [vmem:[%s6441_s1 + $0x14] sm:$0xf0]  ;;  %v3158_v32 = vld [vmem:[%s6441_s1 + $0x108] sm:$0xf] }
  0xa1   : > { %2189 = vmatpush.bf16.msra.mxu3 %v3479_v41  ;;  %v4210_v33 = vld [vmem:[%s6441_s1 + $0x114] sm:$0xf0]  ;;  %v3414_v34 = vld [vmem:[%s6441_s1 + $0x308] sm:$0xf]  ;;  %v3287_v41 = vor.u32 %v4242_v27, %v3286_v24  ;;  %v3031_v42 = vor.u32 %v4178_v29, %v3030_v28 }
  0xa2   : > { %2171 = vmatpush.bf16.msra.mxu2 %v3335_v52  ;;  %2085 = vmatmul.bf16.gmra.mxu1 %v5147_v9  ;;  %v4274_v35 = vld [vmem:[%s6441_s1 + $0x314] sm:$0xf0]  ;;  %v3910_v36 = vld [vmem:[%s6441_s1 + $0x6e8] sm:$0xf]  ;;  %v3159_v47 = vor.u32 %v4210_v33, %v3158_v32  ;;  %v5635_v52 = vld [vmem:[%s6442_s2] sm:$0xf] }
  0xa3   : > { %2152 = vmatpush.bf16.msra.mxu1 %v3207_v60  ;;  %2066 = vmatmul.bf16.gmra.mxu0 %v5145_v8  ;;  %v4398_v37 = vld [vmem:[%s6441_s1 + $0x6f4] sm:$0xf0]  ;;  %v3654_v38 = vld [vmem:[%s6441_s1 + $0x4e8] sm:$0xf]  ;;  %v3415_v49 = vor.u32 %v4274_v35, %v3414_v34  ;;  %v5662_v15 = vperm.slane %v5635_v52, 0 }
  0xa4   : > { %2133 = vmatpush.bf16.msra.mxu0 %v3079_v55  ;;  %2104 = vmatmul.bf16.gmra.mxu2 %v5158_v13  ;;  %v4334_v39 = vld [vmem:[%s6441_s1 + $0x4f4] sm:$0xf0]  ;;  %v3782_v40 = vld [vmem:[%s6441_s1 + $0x5e8] sm:$0xf]  ;;  %v3911_v55 = vor.u32 %v4398_v37, %v3910_v36 }
  0xa5   : > { %2190 = vmatpush.bf16.msra.mxu3 %v3463_v61  ;;  %v4366_v43 = vld [vmem:[%s6441_s1 + $0x5f4] sm:$0xf0]  ;;  %v4038_v45 = vld [vmem:[%s6441_s1 + $0x7e8] sm:$0xf]  ;;  %v3655_v58 = vor.u32 %v4334_v39, %v3654_v38 }
  0xa6   : > { %2172 = vmatpush.bf16.msra.mxu2 %v3319_v10  ;;  %2123 = vmatmul.bf16.gmra.mxu3 %v5160_v14  ;;  %v4430_v46 = vld [vmem:[%s6441_s1 + $0x7f4] sm:$0xf0]  ;;  %v3894_v59 = vld [vmem:[%s6441_s1 + $0x6c8] sm:$0xf]  ;;  %v3783_v61 = vor.u32 %v4366_v43, %v3782_v40 }
  0xa7   : > { %2153 = vmatpush.bf16.msra.mxu1 %v3191_v16  ;;  %v4394_v60 = vld [vmem:[%s6441_s1 + $0x6d4] sm:$0xf0]  ;;  %v4039_v62 = vor.u32 %v4430_v46, %v4038_v45  ;;  %v3638_v63 = vld [vmem:[%s6441_s1 + $0x4c8] sm:$0xf] }
  0xa8   : > { %2134 = vmatpush.bf16.msra.mxu0 %v3063_v11  ;;  %v4330_v2 = vld [vmem:[%s6441_s1 + $0x4d4] sm:$0xf0]  ;;  %v3766_v3 = vld [vmem:[%s6441_s1 + $0x5c8] sm:$0xf]  ;;  %v3895_v11 = vor.u32 %v4394_v60, %v3894_v59 }
  0xa9   : > { %2191 = vmatpush.bf16.msra.mxu3 %v3447_v17  ;;  %v4362_v4 = vld [vmem:[%s6441_s1 + $0x5d4] sm:$0xf0]  ;;  %v4022_v7 = vld [vmem:[%s6441_s1 + $0x7c8] sm:$0xf]  ;;  %v3639_v12 = vor.u32 %v4330_v2, %v3638_v63 }
  0xaa   : > { %2173 = vmatpush.bf16.msra.mxu2 %v3303_v25  ;;  %v4426_v10 = vld [vmem:[%s6441_s1 + $0x7d4] sm:$0xf0]  ;;  %v3767_v16 = vor.u32 %v4362_v4, %v3766_v3  ;;  %v3878_v18 = vld [vmem:[%s6441_s1 + $0x6a8] sm:$0xf] }
  0xab   : > { %2154 = vmatpush.bf16.msra.mxu1 %v3175_v30  ;;  %v4023_v17 = vor.u32 %v4426_v10, %v4022_v7  ;;  %v4390_v19 = vld [vmem:[%s6441_s1 + $0x6b4] sm:$0xf0]  ;;  %v3622_v20 = vld [vmem:[%s6441_s1 + $0x4a8] sm:$0xf]  ;;  %v1853_v28 = vpop.f32.mrf.mxu1 }
  0xac   : > { %2135 = vmatpush.bf16.msra.mxu0 %v3047_v26  ;;  %v4326_v21 = vld [vmem:[%s6441_s1 + $0x4b4] sm:$0xf0]  ;;  %v3750_v22 = vld [vmem:[%s6441_s1 + $0x5a8] sm:$0xf]  ;;  %v3879_v29 = vor.u32 %v4390_v19, %v3878_v18 }
  0xad   : > { %2192 = vmatpush.bf16.msra.mxu3 %v3431_v31  ;;  %v4358_v24 = vld [vmem:[%s6441_s1 + $0x5b4] sm:$0xf0]  ;;  %v4006_v25 = vld [vmem:[%s6441_s1 + $0x7a8] sm:$0xf]  ;;  %v3623_v30 = vor.u32 %v4326_v21, %v3622_v20 }
  0xae   : > { %2174 = vmatpush.bf16.msra.mxu2 %v3287_v41  ;;  %v4422_v26 = vld [vmem:[%s6441_s1 + $0x7b4] sm:$0xf0]  ;;  %v3862_v31 = vld [vmem:[%s6441_s1 + $0x688] sm:$0xf]  ;;  %v3751_v34 = vor.u32 %v4358_v24, %v3750_v22 }
  0xaf   : > { %2155 = vmatpush.bf16.msra.mxu1 %v3159_v47  ;;  %v1834_v23 = vpop.f32.mrf.mxu0  ;;  %v4386_v32 = vld [vmem:[%s6441_s1 + $0x694] sm:$0xf0]  ;;  %v4007_v35 = vor.u32 %v4422_v26, %v4006_v25  ;;  %v3606_v36 = vld [vmem:[%s6441_s1 + $0x488] sm:$0xf] }
  0xb0   : > { %2136 = vmatpush.bf16.msra.mxu0 %v3031_v42  ;;  %v1835_v27 = vadd.f32 %v1834_v23, %v5662_v15  ;;  %v4322_v37 = vld [vmem:[%s6441_s1 + $0x494] sm:$0xf0]  ;;  %v3734_v38 = vld [vmem:[%s6441_s1 + $0x588] sm:$0xf]  ;;  %v3863_v42 = vor.u32 %v4386_v32, %v3862_v31 }
  0xb1   : > { %2193 = vmatpush.bf16.msra.mxu3 %v3415_v49  ;;  %v4354_v39 = vld [vmem:[%s6441_s1 + $0x594] sm:$0xf0]  ;;  %v3990_v40 = vld [vmem:[%s6441_s1 + $0x788] sm:$0xf]  ;;  %v3607_v43 = vor.u32 %v4322_v37, %v3606_v36 }
  0xb2   : > { %2243 = vmatpush.bf16.msrb.mxu2 %v3911_v55  ;;  %v1854_v33 = vadd.f32 %v1853_v28, %v1835_v27  ;;  %2156 = vmatmul.bf16.vlgmr.msra.gmra.mxu1 %v4784_v53  ;;  %v4418_v41 = vld [vmem:[%s6441_s1 + $0x794] sm:$0xf0]  ;;  %v3846_v45 = vld [vmem:[%s6441_s1 + $0x668] sm:$0xf]  ;;  %v3735_v49 = vor.u32 %v4354_v39, %v3734_v38 }
  0xb3   : > { %2224 = vmatpush.bf16.msrb.mxu1 %v3783_v61  ;;  %2137 = vmatmul.bf16.vlgmr.msra.gmra.mxu0 %v4777_v48  ;;  %v4382_v46 = vld [vmem:[%s6441_s1 + $0x674] sm:$0xf0]  ;;  %v3991_v55 = vor.u32 %v4418_v41, %v3990_v40  ;;  %v3718_v60 = vld [vmem:[%s6441_s1 + $0x568] sm:$0xf]  ;;  %v1855_v10 = vpop.f32.mrf.mxu1 }
  0xb4   : > { %2205 = vmatpush.bf16.msrb.mxu0 %v3655_v58  ;;  %2175 = vmatmul.bf16.vlgmr.msra.gmra.mxu2 %v4786_v54  ;;  %v3590_v58 = vld [vmem:[%s6441_s1 + $0x468] sm:$0xf]  ;;  %v4318_v59 = vld [vmem:[%s6441_s1 + $0x474] sm:$0xf0] }
  0xb5   : > { %2262 = vmatpush.bf16.msrb.mxu3 %v4039_v62  ;;  %v1891_v62 = vpop.f32.mrf.mxu3  ;;  %v4350_v2 = vld [vmem:[%s6441_s1 + $0x574] sm:$0xf0]  ;;  %v3974_v3 = vld [vmem:[%s6441_s1 + $0x768] sm:$0xf] }
  0xb6   : > { %2244 = vmatpush.bf16.msrb.mxu2 %v3895_v11  ;;  %2194 = vmatmul.bf16.vlgmr.msra.gmra.mxu3 %v4794_v57  ;;  %v1872_v47 = vpop.f32.mrf.mxu2  ;;  %v4414_v4 = vld [vmem:[%s6441_s1 + $0x774] sm:$0xf0]  ;;  %v3719_v20 = vor.u32 %v4350_v2, %v3718_v60  ;;  %v3574_v22 = vld [vmem:[%s6441_s1 + $0x448] sm:$0xf] }
  0xb7   : > { %2225 = vmatpush.bf16.msrb.mxu1 %v3767_v16  ;;  %v1873_v61 = vadd.f32 %v1872_v47, %v1854_v33  ;;  %v1836_v63 = vpop.f32.mrf.mxu0  ;;  %v3591_v16 = vor.u32 %v4318_v59, %v3590_v58  ;;  %v4378_v18 = vld [vmem:[%s6441_s1 + $0x654] sm:$0xf0]  ;;  %v3975_v21 = vor.u32 %v4414_v4, %v3974_v3  ;;  %v3702_v24 = vld [vmem:[%s6441_s1 + $0x548] sm:$0xf] }
  0xb8   : > { %2206 = vmatpush.bf16.msrb.mxu0 %v3639_v12  ;;  %v1837_v7 = vadd.f32 %v1836_v63, %v5662_v15  ;;  %v3847_v12 = vor.u32 %v4382_v46, %v3846_v45  ;;  %v4314_v23 = vld [vmem:[%s6441_s1 + $0x454] sm:$0xf0]  ;;  %v3958_v26 = vld [vmem:[%s6441_s1 + $0x748] sm:$0xf] }
  0xb9   : > { %2263 = vmatpush.bf16.msrb.mxu3 %v4023_v17  ;;  %v5742_v11 = vadd.f32 %v1891_v62, %v1873_v61  ;;  %v3830_v17 = vld [vmem:[%s6441_s1 + $0x648] sm:$0xf]  ;;  %v4346_v25 = vld [vmem:[%s6441_s1 + $0x554] sm:$0xf0] }
  0xba   : > { %2245 = vmatpush.bf16.msrb.mxu2 %v3879_v29  ;;  %v1856_v19 = vadd.f32 %v1855_v10, %v1837_v7  ;;  %v4410_v27 = vld [vmem:[%s6441_s1 + $0x754] sm:$0xf0]  ;;  %v3831_v28 = vor.u32 %v4378_v18, %v3830_v17  ;;  %v3575_v29 = vor.u32 %v4314_v23, %v3574_v22  ;;  %v3703_v33 = vor.u32 %v4346_v25, %v3702_v24  ;;  %v3686_v37 = vld [vmem:[%s6441_s1 + $0x528] sm:$0xf]  ;;  %v4204_v17 = vld [vmem:[%s6441_s1 + $0xec] sm:$0xf] }
  0xbb   : > { %2226 = vmatpush.bf16.msrb.mxu1 %v3751_v34  ;;  %v4374_v31 = vld [vmem:[%s6441_s1 + $0x634] sm:$0xf0]  ;;  %v3959_v34 = vor.u32 %v4410_v27, %v3958_v26  ;;  %v1858_v46 = vpop.f32.mrf.mxu1  ;;  %v3798_v47 = vld [vmem:[%s6441_s1 + $0x608] sm:$0xf]  ;;  %v3144_v18 = vld [vmem:[%s6441_s1 + $0xf8] sm:$0xf0] }
  0xbc   : > { %2207 = vmatpush.bf16.msrb.mxu0 %v3623_v30  ;;  %v3814_v30 = vld [vmem:[%s6441_s1 + $0x628] sm:$0xf]  ;;  %v4310_v36 = vld [vmem:[%s6441_s1 + $0x434] sm:$0xf0]  ;;  %v3272_v22 = vld [vmem:[%s6441_s1 + $0x1f8] sm:$0xf0] }
  0xbd   : > { %2264 = vmatpush.bf16.msrb.mxu3 %v4007_v35  ;;  %v3558_v35 = vld [vmem:[%s6441_s1 + $0x428] sm:$0xf]  ;;  %v1893_v39 = vpop.f32.mrf.mxu3  ;;  %v4342_v41 = vld [vmem:[%s6441_s1 + $0x534] sm:$0xf0]  ;;  %v4300_v23 = vld [vmem:[%s6441_s1 + $0x3ec] sm:$0xf] }
  0xbe   : > { %2246 = vmatpush.bf16.msrb.mxu2 %v3863_v42  ;;  %v1874_v32 = vpop.f32.mrf.mxu2  ;;  %v3942_v42 = vld [vmem:[%s6441_s1 + $0x728] sm:$0xf]  ;;  %v3559_v58 = vor.u32 %v4310_v36, %v3558_v35  ;;  %v4370_v59 = vld [vmem:[%s6441_s1 + $0x614] sm:$0xf0]  ;;  %v3687_v63 = vor.u32 %v4342_v41, %v3686_v37  ;;  %v3528_v24 = vld [vmem:[%s6441_s1 + $0x3f8] sm:$0xf0] }
  0xbf   : > { %2227 = vmatpush.bf16.msrb.mxu1 %v3735_v49  ;;  %v1875_v38 = vadd.f32 %v1874_v32, %v1856_v19  ;;  %v1839_v40 = vpop.f32.mrf.mxu0  ;;  %v3542_v60 = vld [vmem:[%s6441_s1 + $0x408] sm:$0xf]  ;;  %v4306_v61 = vld [vmem:[%s6441_s1 + $0x414] sm:$0xf0]  ;;  %v4236_v19 = vld [vmem:[%s6441_s1 + $0x1ec] sm:$0xf]  ;;  %v3147_v32 = vor.u32 %v4204_v17, %v3144_v18 }
  0xc0   : > { %2208 = vmatpush.bf16.msrb.mxu0 %v3607_v43  ;;  %v4406_v43 = vld [vmem:[%s6441_s1 + $0x734] sm:$0xf0]  ;;  %v1840_v45 = vadd.f32 %v1839_v40, %v5662_v15  ;;  %v3670_v3 = vld [vmem:[%s6441_s1 + $0x508] sm:$0xf]  ;;  %v3275_v37 = vor.u32 %v4236_v19, %v3272_v22  ;;  %v3128_v40 = vld [vmem:[%s6441_s1 + $0xd8] sm:$0xf0] }
  0xc1   : > { %2265 = vmatpush.bf16.msrb.mxu3 %v3991_v55  ;;  %v5796_v49 = vadd.f32 %v1893_v39, %v1875_v38  ;;  %v3815_v55 = vor.u32 %v4374_v31, %v3814_v30  ;;  %v3943_v2 = vor.u32 %v4406_v43, %v3942_v42  ;;  %v4338_v4 = vld [vmem:[%s6441_s1 + $0x514] sm:$0xf0]  ;;  %v3926_v7 = vld [vmem:[%s6441_s1 + $0x708] sm:$0xf]  ;;  %v3531_v38 = vor.u32 %v4300_v23, %v3528_v24  ;;  %v4200_v39 = vld [vmem:[%s6441_s1 + $0xcc] sm:$0xf] }
  0xc2   : > { %2247 = vmatpush.bf16.msrb.mxu2 %v3847_v12  ;;  %v1859_v62 = vadd.f32 %v1858_v46, %v1840_v45  ;;  %2161 = vmatmul.bf16.gmra.mxu1 %v4900_v50  ;;  %v4402_v10 = vld [vmem:[%s6441_s1 + $0x714] sm:$0xf0]  ;;  %v4268_v12 = vld [vmem:[%s6441_s1 + $0x2ec] sm:$0xf]  ;;  %v3671_v26 = vor.u32 %v4338_v4, %v3670_v3  ;;  %v3512_v45 = vld [vmem:[%s6441_s1 + $0x3d8] sm:$0xf0] }
  0xc3   : > { %2228 = vmatpush.bf16.msrb.mxu1 %v3719_v20  ;;  %2142 = vmatmul.bf16.gmra.mxu0 %v4889_v44  ;;  %v3799_v20 = vor.u32 %v4370_v59, %v3798_v47  ;;  %v3927_v27 = vor.u32 %v4402_v10, %v3926_v7  ;;  %v1860_v36 = vpop.f32.mrf.mxu1  ;;  %v4232_v41 = vld [vmem:[%s6441_s1 + $0x1cc] sm:$0xf]  ;;  %v3240_v10 = vld [vmem:[%s6441_s1 + $0x1b8] sm:$0xf0] }
  0xc4   : > { %2209 = vmatpush.bf16.msrb.mxu0 %v3591_v16  ;;  %v3400_v16 = vld [vmem:[%s6441_s1 + $0x2f8] sm:$0xf0]  ;;  %2180 = vmatmul.bf16.gmra.mxu2 %v4902_v51  ;;  %v4296_v43 = vld [vmem:[%s6441_s1 + $0x3cc] sm:$0xf] }
  0xc5   : > { %2266 = vmatpush.bf16.msrb.mxu3 %v3975_v21  ;;  %v3543_v21 = vor.u32 %v4306_v61, %v3542_v60  ;;  %v3403_v31 = vor.u32 %v4268_v12, %v3400_v16  ;;  %v3515_v59 = vor.u32 %v4296_v43, %v3512_v45  ;;  %v4260_v60 = vld [vmem:[%s6441_s1 + $0x2ac] sm:$0xf]  ;;  %v3368_v61 = vld [vmem:[%s6441_s1 + $0x2b8] sm:$0xf0] }
  0xc6   : > { %2248 = vmatpush.bf16.msrb.mxu2 %v3831_v28  ;;  %2199 = vmatmul.bf16.gmra.mxu3 %v4910_v56  ;;  %v1877_v25 = vpop.f32.mrf.mxu2  ;;  %v4228_v3 = vld [vmem:[%s6441_s1 + $0x1ac] sm:$0xf]  ;;  %v3496_v16 = vld [vmem:[%s6441_s1 + $0x3b8] sm:$0xf0] }
  0xc7   : > { %2229 = vmatpush.bf16.msrb.mxu1 %v3703_v33  ;;  %v1878_v28 = vadd.f32 %v1877_v25, %v1859_v62  ;;  %v1841_v30 = vpop.f32.mrf.mxu0  ;;  %v4264_v33 = vld [vmem:[%s6441_s1 + $0x2cc] sm:$0xf]  ;;  %v3352_v24 = vld [vmem:[%s6441_s1 + $0x298] sm:$0xf0]  ;;  %v3243_v25 = vor.u32 %v4228_v3, %v3240_v10 }
  0xc8   : > { %2210 = vmatpush.bf16.msrb.mxu0 %v3575_v29  ;;  %v1896_v29 = vpop.f32.mrf.mxu3  ;;  %v1842_v35 = vadd.f32 %v1841_v30, %v5662_v15  ;;  %v3256_v15 = vld [vmem:[%s6441_s1 + $0x1d8] sm:$0xf0]  ;;  %v4292_v12 = vld [vmem:[%s6441_s1 + $0x3ac] sm:$0xf] }
  0xc9   : > { %2267 = vmatpush.bf16.msrb.mxu3 %v3959_v34  ;;  %v3384_v34 = vld [vmem:[%s6441_s1 + $0x2d8] sm:$0xf0]  ;;  %v5863_v42 = vadd.f32 %v1896_v29, %v1878_v28  ;;  %v4256_v23 = vld [vmem:[%s6441_s1 + $0x28c] sm:$0xf] }
  0xca   : > { %2249 = vmatpush.bf16.msrb.mxu2 %v3815_v55  ;;  %v1861_v46 = vadd.f32 %v1860_v36, %v1842_v35  ;;  %v3387_v47 = vor.u32 %v4264_v33, %v3384_v34  ;;  %v3131_v55 = vor.u32 %v4200_v39, %v3128_v40  ;;  %v4224_v28 = vld [vmem:[%s6441_s1 + $0x18c] sm:$0xf]  ;;  %v3224_v30 = vld [vmem:[%s6441_s1 + $0x198] sm:$0xf0]  ;;  %v3355_v33 = vor.u32 %v4256_v23, %v3352_v24 }
  0xcb   : > { %2230 = vmatpush.bf16.msrb.mxu1 %v3687_v63  ;;  %v4196_v63 = vld [vmem:[%s6441_s1 + $0xac] sm:$0xf]  ;;  %v3336_v36 = vld [vmem:[%s6441_s1 + $0x278] sm:$0xf0] }
  0xcc   : > { %2211 = vmatpush.bf16.msrb.mxu0 %v3559_v58  ;;  %v3259_v58 = vor.u32 %v4232_v41, %v3256_v15  ;;  %v4252_v35 = vld [vmem:[%s6441_s1 + $0x26c] sm:$0xf]  ;;  %v3080_v40 = vld [vmem:[%s6441_s1 + $0x78] sm:$0xf0] }
  0xcd   : > { %2268 = vmatpush.bf16.msrb.mxu3 %v3943_v2  ;;  %v3112_v2 = vld [vmem:[%s6441_s1 + $0xb8] sm:$0xf0]  ;;  %v4188_v39 = vld [vmem:[%s6441_s1 + $0x6c] sm:$0xf] }
  0xce   : > { %2250 = vmatpush.bf16.msrb.mxu2 %v3799_v20  ;;  %v1879_v62 = vpop.f32.mrf.mxu2  ;;  %v3115_v22 = vor.u32 %v4196_v63, %v3112_v2  ;;  %v4220_v41 = vld [vmem:[%s6441_s1 + $0x16c] sm:$0xf]  ;;  %v3208_v45 = vld [vmem:[%s6441_s1 + $0x178] sm:$0xf0] }
  0xcf   : > { %2231 = vmatpush.bf16.msrb.mxu1 %v3671_v26  ;;  %v1880_v4 = vadd.f32 %v1879_v62, %v1861_v46  ;;  %v1929_v18 = vpop.f32.mrf.mxu1  ;;  %v3499_v26 = vor.u32 %v4292_v12, %v3496_v16  ;;  %v4284_v46 = vld [vmem:[%s6441_s1 + $0x36c] sm:$0xf]  ;;  %v3083_v62 = vor.u32 %v4188_v39, %v3080_v40  ;;  %v3320_v2 = vld [vmem:[%s6441_s1 + $0x258] sm:$0xf0] }
  0xd0   : > { %2212 = vmatpush.bf16.msrb.mxu0 %v3543_v21  ;;  %v1898_v7 = vpop.f32.mrf.mxu3  ;;  %v1910_v17 = vpop.f32.mrf.mxu0  ;;  %v3371_v21 = vor.u32 %v4260_v60, %v3368_v61  ;;  %v3339_v61 = vor.u32 %v4252_v35, %v3336_v36  ;;  %v4248_v63 = vld [vmem:[%s6441_s1 + $0x24c] sm:$0xf]  ;;  %v3064_v10 = vld [vmem:[%s6441_s1 + $0x58] sm:$0xf0] }
  0xd1   : > { %2269 = vmatpush.bf16.msrb.mxu3 %v3927_v27  ;;  %v5898_v19 = vadd.f32 %v1898_v7, %v1880_v4  ;;  %v1911_v20 = vadd.f32 %v1910_v17, %v5742_v11  ;;  %v4192_v27 = vld [vmem:[%s6441_s1 + $0x8c] sm:$0xf]  ;;  %v3096_v11 = vld [vmem:[%s6441_s1 + $0x98] sm:$0xf0]  ;;  %v3211_v4 = vor.u32 %v4220_v41, %v3208_v45 }
  0xd2   : > { %2319 = vmatpush.bf16.msra.mxu2 %v3403_v31  ;;  %2232 = vmatmul.bf16.vlgmr.msrb.gmra.mxu1 %v5031_v1  ;;  %v4288_v31 = vld [vmem:[%s6441_s1 + $0x38c] sm:$0xf]  ;;  %v3099_v34 = vor.u32 %v4192_v27, %v3096_v11  ;;  %v3192_v17 = vld [vmem:[%s6441_s1 + $0x158] sm:$0xf0] }
  0xd3   : > { %2300 = vmatpush.bf16.msra.mxu1 %v3275_v37  ;;  %v1930_v29 = vadd.f32 %v1929_v18, %v1911_v20  ;;  %2213 = vmatmul.bf16.vlgmr.msrb.gmra.mxu0 %v5029_v0  ;;  %v3227_v37 = vor.u32 %v4224_v28, %v3224_v30  ;;  %v4216_v12 = vld [vmem:[%s6441_s1 + $0x14c] sm:$0xf]  ;;  %v3448_v20 = vld [vmem:[%s6441_s1 + $0x358] sm:$0xf0] }
  0xd4   : > { %2281 = vmatpush.bf16.msra.mxu0 %v3147_v32  ;;  %v3480_v32 = vld [vmem:[%s6441_s1 + $0x398] sm:$0xf0]  ;;  %2251 = vmatmul.bf16.vlgmr.msrb.gmra.mxu2 %v5042_v5  ;;  %v4280_v18 = vld [vmem:[%s6441_s1 + $0x34c] sm:$0xf] }
  0xd5   : > { %2338 = vmatpush.bf16.msra.mxu3 %v3531_v38  ;;  %v3483_v38 = vor.u32 %v4288_v31, %v3480_v32  ;;  %v4244_v23 = vld [vmem:[%s6441_s1 + $0x22c] sm:$0xf]  ;;  %v3304_v24 = vld [vmem:[%s6441_s1 + $0x238] sm:$0xf0] }
  0xd6   : > { %2320 = vmatpush.bf16.msra.mxu2 %v3387_v47  ;;  %2270 = vmatmul.bf16.vlgmr.msrb.gmra.mxu3 %v5044_v6  ;;  %v3464_v47 = vld [vmem:[%s6441_s1 + $0x378] sm:$0xf0]  ;;  %v4180_v27 = vld [vmem:[%s6441_s1 + $0x2c] sm:$0xf]  ;;  %v3307_v40 = vor.u32 %v4244_v23, %v3304_v24 }
  0xd7   : > { %2301 = vmatpush.bf16.msra.mxu1 %v3259_v58  ;;  %v1948_v15 = vpop.f32.mrf.mxu2  ;;  %v3467_v7 = vor.u32 %v4284_v46, %v3464_v47  ;;  %v3048_v11 = vld [vmem:[%s6441_s1 + $0x38] sm:$0xf0]  ;;  %v4212_v28 = vld [vmem:[%s6441_s1 + $0x12c] sm:$0xf] }
  0xd8   : > { %2282 = vmatpush.bf16.msra.mxu0 %v3131_v55  ;;  %v1949_v55 = vadd.f32 %v1948_v15, %v1930_v29  ;;  %v1912_v58 = vpop.f32.mrf.mxu0  ;;  %v3176_v31 = vld [vmem:[%s6441_s1 + $0x138] sm:$0xf0]  ;;  %v4276_v32 = vld [vmem:[%s6441_s1 + $0x32c] sm:$0xf]  ;;  %v3051_v41 = vor.u32 %v4180_v27, %v3048_v11 }
  0xd9   : > { %2339 = vmatpush.bf16.msra.mxu3 %v3515_v59  ;;  %v1967_v43 = vpop.f32.mrf.mxu3  ;;  %v1931_v59 = vpop.f32.mrf.mxu1  ;;  %v1913_v60 = vadd.f32 %v1912_v58, %v5796_v49  ;;  %v4184_v49 = vld [vmem:[%s6441_s1 + $0x4c] sm:$0xf]  ;;  %v3896_v27 = vld [vmem:[%s6441_s1 + $0x6d8] sm:$0xf0] }
  0xda   : > { %2321 = vmatpush.bf16.msra.mxu2 %v3371_v21  ;;  %v5960_v3 = vadd.f32 %v1967_v43, %v1949_v55  ;;  %v3323_v21 = vor.u32 %v4248_v63, %v3320_v2  ;;  %v4176_v15 = vld [vmem:[%s6441_s1 + $0xc] sm:$0xf]  ;;  %v3032_v43 = vld [vmem:[%s6441_s1 + $0x18] sm:$0xf0] }
  0xdb   : > { %2302 = vmatpush.bf16.msra.mxu1 %v3243_v25  ;;  %v1932_v16 = vadd.f32 %v1931_v59, %v1913_v60  ;;  %v3195_v25 = vor.u32 %v4216_v12, %v3192_v17  ;;  %v4208_v45 = vld [vmem:[%s6441_s1 + $0x10c] sm:$0xf]  ;;  %v3160_v55 = vld [vmem:[%s6441_s1 + $0x118] sm:$0xf0]  ;;  %v3035_v12 = vor.u32 %v4176_v15, %v3032_v43 }
  0xdc   : > { %2283 = vmatpush.bf16.msra.mxu0 %v3115_v22  ;;  %v3067_v22 = vor.u32 %v4184_v49, %v3064_v10  ;;  %v4272_v58 = vld [vmem:[%s6441_s1 + $0x30c] sm:$0xf]  ;;  %v3416_v59 = vld [vmem:[%s6441_s1 + $0x318] sm:$0xf0]  ;;  %v2433_v2 = vmax.f32 %v5960_v3, 0.0 }
  0xdd   : > { %2340 = vmatpush.bf16.msra.mxu3 %v3499_v26  ;;  %v3451_v26 = vor.u32 %v4280_v18, %v3448_v20  ;;  %v4332_v63 = vld [vmem:[%s6441_s1 + $0x4ec] sm:$0xf]  ;;  %v3784_v3 = vld [vmem:[%s6441_s1 + $0x5f8] sm:$0xf0]  ;;  %v3163_v20 = vor.u32 %v4208_v45, %v3160_v55 }
  0xde   : > { %2322 = vmatpush.bf16.msra.mxu2 %v3355_v33  ;;  %v3432_v33 = vld [vmem:[%s6441_s1 + $0x338] sm:$0xf0]  ;;  %v4364_v49 = vld [vmem:[%s6441_s1 + $0x5ec] sm:$0xf] }
  0xdf   : > { %2303 = vmatpush.bf16.msra.mxu1 %v3227_v37  ;;  %v1950_v29 = vpop.f32.mrf.mxu2  ;;  %v4240_v37 = vld [vmem:[%s6441_s1 + $0x20c] sm:$0xf]  ;;  %v3435_v47 = vor.u32 %v4276_v32, %v3432_v33  ;;  %v4040_v17 = vld [vmem:[%s6441_s1 + $0x7f8] sm:$0xf0] }
  0xe0   : > { %2284 = vmatpush.bf16.msra.mxu0 %v3099_v34  ;;  %v1951_v34 = vadd.f32 %v1950_v29, %v1932_v16  ;;  %v1915_v35 = vpop.f32.mrf.mxu0  ;;  %v4428_v16 = vld [vmem:[%s6441_s1 + $0x7ec] sm:$0xf]  ;;  %v3640_v33 = vld [vmem:[%s6441_s1 + $0x4d8] sm:$0xf0] }
  0xe1   : > { %2341 = vmatpush.bf16.msra.mxu3 %v3483_v38  ;;  %v1969_v30 = vpop.f32.mrf.mxu3  ;;  %v1934_v36 = vpop.f32.mrf.mxu1  ;;  %v3288_v38 = vld [vmem:[%s6441_s1 + $0x218] sm:$0xf0]  ;;  %v1916_v39 = vadd.f32 %v1915_v35, %v5863_v42  ;;  %v3179_v42 = vor.u32 %v4212_v28, %v3176_v31  ;;  %v4043_v31 = vor.u32 %v4428_v16, %v4040_v17  ;;  %v4328_v32 = vld [vmem:[%s6441_s1 + $0x4cc] sm:$0xf] }
  0xe2   : > { %2323 = vmatpush.bf16.msra.mxu2 %v3339_v61  ;;  %v1970_v46 = vadd.f32 %v1969_v30, %v1951_v34  ;;  %2237 = vmatmul.bf16.gmra.mxu1 %v5147_v9  ;;  %v4396_v61 = vld [vmem:[%s6441_s1 + $0x6ec] sm:$0xf]  ;;  %v3291_v10 = vor.u32 %v4240_v37, %v3288_v38  ;;  %v3787_v30 = vor.u32 %v4364_v49, %v3784_v3  ;;  %v4024_v38 = vld [vmem:[%s6441_s1 + $0x7d8] sm:$0xf0] }
  0xe3   : > { %2304 = vmatpush.bf16.msra.mxu1 %v3211_v4  ;;  %v1935_v60 = vadd.f32 %v1934_v36, %v1916_v39  ;;  %2218 = vmatmul.bf16.gmra.mxu0 %v5145_v8  ;;  %v4360_v34 = vld [vmem:[%s6441_s1 + $0x5cc] sm:$0xf]  ;;  %v3768_v36 = vld [vmem:[%s6441_s1 + $0x5d8] sm:$0xf0] }
  0xe4   : > { %2285 = vmatpush.bf16.msra.mxu0 %v3083_v62  ;;  %v3912_v62 = vld [vmem:[%s6441_s1 + $0x6f8] sm:$0xf0]  ;;  %v2437_v4 = vmax.f32 %v1970_v46, 0.0  ;;  %2256 = vmatmul.bf16.gmra.mxu2 %v5158_v13  ;;  %v4424_v37 = vld [vmem:[%s6441_s1 + $0x7cc] sm:$0xf]  ;;  %v3771_v15 = vor.u32 %v4360_v34, %v3768_v36 }
  0xe5   : > { %2342 = vmatpush.bf16.msra.mxu3 %v3467_v7  ;;  %v3656_v7 = vld [vmem:[%s6441_s1 + $0x4f8] sm:$0xf0]  ;;  %v3915_v24 = vor.u32 %v4396_v61, %v3912_v62  ;;  %v4027_v43 = vor.u32 %v4424_v37, %v4024_v38  ;;  %v4388_v45 = vld [vmem:[%s6441_s1 + $0x6ac] sm:$0xf] }
  0xe6   : > { %2324 = vmatpush.bf16.msra.mxu2 %v3323_v21  ;;  %2275 = vmatmul.bf16.gmra.mxu3 %v5160_v14  ;;  %v6058_v18 = vpack.c.bf16 %v2437_v4, %v2433_v2  ;;  %v3419_v21 = vor.u32 %v4272_v58, %v3416_v59  ;;  %v3880_v46 = vld [vmem:[%s6441_s1 + $0x6b8] sm:$0xf0]  ;;  %v4356_v55 = vld [vmem:[%s6441_s1 + $0x5ac] sm:$0xf] }
  0xe7   : > { %2305 = vmatpush.bf16.msra.mxu1 %v3195_v25  ;;  %v3659_v25 = vor.u32 %v4332_v63, %v3656_v7  ;;  %v4420_v61 = vld [vmem:[%s6441_s1 + $0x7ac] sm:$0xf]  ;;  %v4008_v62 = vld [vmem:[%s6441_s1 + $0x7b8] sm:$0xf0]  ;;  %v3883_v7 = vor.u32 %v4388_v45, %v3880_v46 }
  0xe8   : > { %2286 = vmatpush.bf16.msra.mxu0 %v3067_v22  ;;  %v1953_v22 = vpop.f32.mrf.mxu2  ;;  %v1917_v28 = vpop.f32.mrf.mxu0  ;;  %v4011_v17 = vor.u32 %v4420_v61, %v4008_v62  ;;  %v4412_v36 = vld [vmem:[%s6441_s1 + $0x76c] sm:$0xf]  ;;  %v3976_v37 = vld [vmem:[%s6441_s1 + $0x778] sm:$0xf0] }
  0xe9   : > { %2343 = vmatpush.bf16.msra.mxu3 %v3451_v26  ;;  %v1972_v23 = vpop.f32.mrf.mxu3  ;;  %v4392_v26 = vld [vmem:[%s6441_s1 + $0x6cc] sm:$0xf]  ;;  %v1954_v11 = vadd.f32 %v1953_v22, %v1935_v60  ;;  %v1936_v29 = vpop.f32.mrf.mxu1  ;;  %v1918_v35 = vadd.f32 %v1917_v28, %v5898_v19  ;;  %v3752_v60 = vld [vmem:[%s6441_s1 + $0x5b8] sm:$0xf0]  ;;  %v3979_v45 = vor.u32 %v4412_v36, %v3976_v37 }
  0xea   : > { %2325 = vmatpush.bf16.msra.mxu2 %v3307_v40  ;;  %v3899_v19 = vor.u32 %v4392_v26, %v3896_v27  ;;  %v3755_v16 = vor.u32 %v4356_v55, %v3752_v60  ;;  %v4352_v22 = vld [vmem:[%s6441_s1 + $0x58c] sm:$0xf]  ;;  %v3848_v28 = vld [vmem:[%s6441_s1 + $0x678] sm:$0xf0] }
  0xeb   : > { %2306 = vmatpush.bf16.msra.mxu1 %v3179_v42  ;;  %v1973_v39 = vadd.f32 %v1972_v23, %v1954_v11  ;;  %v1937_v40 = vadd.f32 %v1936_v29, %v1918_v35  ;;  %v4324_v42 = vld [vmem:[%s6441_s1 + $0x4ac] sm:$0xf]  ;;  %v3736_v23 = vld [vmem:[%s6441_s1 + $0x598] sm:$0xf0] }
  0xec   : > { %2287 = vmatpush.bf16.msra.mxu0 %v3051_v41  ;;  %v3643_v41 = vor.u32 %v4328_v32, %v3640_v33  ;;  %v4380_v11 = vld [vmem:[%s6441_s1 + $0x66c] sm:$0xf]  ;;  %v3739_v29 = vor.u32 %v4352_v22, %v3736_v23  ;;  %v3720_v35 = vld [vmem:[%s6441_s1 + $0x578] sm:$0xf0] }
  0xed   : > { %2344 = vmatpush.bf16.msra.mxu3 %v3435_v47  ;;  %v3624_v47 = vld [vmem:[%s6441_s1 + $0x4b8] sm:$0xf0]  ;;  %v2441_v26 = vmax.f32 %v1973_v39, 0.0  ;;  %v4312_v46 = vld [vmem:[%s6441_s1 + $0x44c] sm:$0xf] }
  0xee   : > { %2326 = vmatpush.bf16.msra.mxu2 %v3291_v10  ;;  %v3627_v49 = vor.u32 %v4324_v42, %v3624_v47  ;;  %v4384_v10 = vld [vmem:[%s6441_s1 + $0x68c] sm:$0xf]  ;;  %v3576_v42 = vld [vmem:[%s6441_s1 + $0x458] sm:$0xf0] }
  0xef   : > { %2307 = vmatpush.bf16.msra.mxu1 %v3163_v20  ;;  %v4320_v20 = vld [vmem:[%s6441_s1 + $0x48c] sm:$0xf]  ;;  %v3704_v55 = vld [vmem:[%s6441_s1 + $0x558] sm:$0xf0]  ;;  %v3579_v61 = vor.u32 %v4312_v46, %v3576_v42 }
  0xf0   : > { %2288 = vmatpush.bf16.msra.mxu0 %v3035_v12  ;;  %v1955_v58 = vpop.f32.mrf.mxu2  ;;  %v6109_v2 = vpop.f32.mrf.mxu0  ;;  %v3864_v12 = vld [vmem:[%s6441_s1 + $0x698] sm:$0xf0]  ;;  %v4344_v47 = vld [vmem:[%s6441_s1 + $0x54c] sm:$0xf] }
  0xf1   : > { %2345 = vmatpush.bf16.msra.mxu3 %v3419_v21  ;;  %v1974_v59 = vpop.f32.mrf.mxu3  ;;  %v1956_v63 = vadd.f32 %v1955_v58, %v1937_v40  ;;  %v6111_v4 = vpop.f32.mrf.mxu1  ;;  %v3608_v21 = vld [vmem:[%s6441_s1 + $0x498] sm:$0xf0]  ;;  %v3851_v40 = vor.u32 %v4380_v11, %v3848_v28  ;;  %v4408_v58 = vld [vmem:[%s6441_s1 + $0x74c] sm:$0xf] }
  0xf2   : > { %2395 = vmatpush.bf16.msrb.mxu2 %v3915_v24  ;;  %2308 = vmatmul.bf16.vlgmr.msra.gmra.mxu1 %v4784_v53  ;;  %v4416_v24 = vld [vmem:[%s6441_s1 + $0x78c] sm:$0xf]  ;;  %v3611_v53 = vor.u32 %v4320_v20, %v3608_v21  ;;  %v3688_v20 = vld [vmem:[%s6441_s1 + $0x538] sm:$0xf0] }
  0xf3   : > { %2376 = vmatpush.bf16.msrb.mxu1 %v3787_v30  ;;  %v1975_v3 = vadd.f32 %v1974_v59, %v1956_v63  ;;  %2289 = vmatmul.bf16.vlgmr.msra.gmra.mxu0 %v4777_v48  ;;  %v3867_v48 = vor.u32 %v4384_v10, %v3864_v12  ;;  %v3960_v59 = vld [vmem:[%s6441_s1 + $0x758] sm:$0xf0]  ;;  %v4372_v62 = vld [vmem:[%s6441_s1 + $0x62c] sm:$0xf] }
  0xf4   : > { %2357 = vmatpush.bf16.msrb.mxu0 %v3659_v25  ;;  %v3992_v25 = vld [vmem:[%s6441_s1 + $0x798] sm:$0xf0]  ;;  %2327 = vmatmul.bf16.vlgmr.msra.gmra.mxu2 %v4786_v54  ;;  %v4316_v54 = vld [vmem:[%s6441_s1 + $0x46c] sm:$0xf] }
  0xf5   : > { %2414 = vmatpush.bf16.msrb.mxu3 %v4043_v31  ;;  %v2445_v27 = vmax.f32 %v1975_v3, 0.0  ;;  %v3995_v30 = vor.u32 %v4416_v24, %v3992_v25  ;;  %v4348_v31 = vld [vmem:[%s6441_s1 + $0x56c] sm:$0xf]  ;;  %v3816_v63 = vld [vmem:[%s6441_s1 + $0x638] sm:$0xf0] }
  0xf6   : > { %2396 = vmatpush.bf16.msrb.mxu2 %v3899_v19  ;;  %2346 = vmatmul.bf16.vlgmr.msra.gmra.mxu3 %v4794_v57  ;;  %v3592_v57 = vld [vmem:[%s6441_s1 + $0x478] sm:$0xf0]  ;;  %v4308_v10 = vld [vmem:[%s6441_s1 + $0x42c] sm:$0xf]  ;;  %v3819_v25 = vor.u32 %v4372_v62, %v3816_v63 }
  0xf7   : > { %2377 = vmatpush.bf16.msrb.mxu1 %v3771_v15  ;;  %v6156_v32 = vpack.c.bf16 %v2445_v27, %v2441_v26  ;;  %v3595_v19 = vor.u32 %v4316_v54, %v3592_v57  ;;  %v3832_v15 = vld [vmem:[%s6441_s1 + $0x658] sm:$0xf0]  ;;  %v4340_v3 = vld [vmem:[%s6441_s1 + $0x52c] sm:$0xf] }
  0xf8   : > { %2358 = vmatpush.bf16.msrb.mxu0 %v3643_v41  ;;  %v6158_v33 = vpop.f32.mrf.mxu2  ;;  %v6171_v38 = vpop.f32.mrf.mxu0  ;;  %v4376_v41 = vld [vmem:[%s6441_s1 + $0x64c] sm:$0xf]  ;;  %v3560_v12 = vld [vmem:[%s6441_s1 + $0x438] sm:$0xf0] }
  0xf9   : > { %2415 = vmatpush.bf16.msrb.mxu3 %v4027_v43  ;;  %v6160_v34 = vpop.f32.mrf.mxu3  ;;  %v6173_v39 = vpop.f32.mrf.mxu1  ;;  %v3723_v43 = vor.u32 %v4348_v31, %v3720_v35  ;;  %v3835_v60 = vor.u32 %v4376_v41, %v3832_v15  ;;  %v4404_v21 = vld [vmem:[%s6441_s1 + $0x72c] sm:$0xf]  ;;  %v3944_v22 = vld [vmem:[%s6441_s1 + $0x738] sm:$0xf0]  ;;  %v3563_v26 = vor.u32 %v4308_v10, %v3560_v12  ;;  %v4437_v15 = vld [vmem:[%s6443_s3 + $0x30] sm:$0xff] }
  0xfa   : > { %2397 = vmatpush.bf16.msrb.mxu2 %v3883_v7  ;;  %v3707_v7 = vor.u32 %v4344_v47, %v3704_v55  ;;  %v4368_v27 = vld [vmem:[%s6441_s1 + $0x60c] sm:$0xf]  ;;  %v3947_v11 = vor.u32 %v4404_v21, %v3944_v22  ;;  %v3672_v54 = vld [vmem:[%s6441_s1 + $0x518] sm:$0xf0]  ;;  %v4433_v10 = vld [vmem:[%s6443_s3 + $0x10] sm:$0xff] }
  0xfb   : > { %2378 = vmatpush.bf16.msrb.mxu1 %v3755_v16  ;;  %v4304_v28 = vld [vmem:[%s6441_s1 + $0x40c] sm:$0xf]  ;;  %v3928_v31 = vld [vmem:[%s6441_s1 + $0x718] sm:$0xf0]  ;;  %v4441_v12 = vld [vmem:[%s6443_s3 + $0x50] sm:$0xff] }
  0xfc   : > { %2359 = vmatpush.bf16.msrb.mxu0 %v3627_v49  ;;  %v3963_v49 = vor.u32 %v4408_v58, %v3960_v59  ;;  %v4400_v57 = vld [vmem:[%s6441_s1 + $0x70c] sm:$0xf] }
  0xfd   : > { %2416 = vmatpush.bf16.msrb.mxu3 %v4011_v17  ;;  %v3931_v36 = vor.u32 %v4400_v57, %v3928_v31  ;;  %v4436_v58 = vld [vmem:[%s6443_s3 + $0x28] sm:$0xff] }
  0xfe   : > { %2398 = vmatpush.bf16.msrb.mxu2 %v3867_v48  ;;  %v3800_v48 = vld [vmem:[%s6441_s1 + $0x618] sm:$0xf0]  ;;  %v4444_v59 = vld [vmem:[%s6443_s3 + $0x68] sm:$0xff] }
  0xff   : > { %2379 = vmatpush.bf16.msrb.mxu1 %v3739_v29  ;;  %v3544_v29 = vld [vmem:[%s6441_s1 + $0x418] sm:$0xf0] }
 0x100   : > { %2360 = vmatpush.bf16.msrb.mxu0 %v3611_v53  ;;  %v6214_v16 = vpop.f32.mrf.mxu2  ;;  %v6227_v23 = vpop.f32.mrf.mxu0  ;;  %v3691_v53 = vor.u32 %v4340_v3, %v3688_v20 }
 0x101   : > { %2417 = vmatpush.bf16.msrb.mxu3 %v3995_v30  ;;  %v6216_v17 = vpop.f32.mrf.mxu3  ;;  %v6229_v24 = vpop.f32.mrf.mxu1  ;;  %v4336_v30 = vld [vmem:[%s6441_s1 + $0x50c] sm:$0xf] }
 0x102   : > { %2399 = vmatpush.bf16.msrb.mxu2 %v3851_v40  ;;  %2313 = vmatmul.bf16.gmra.mxu1 %v4900_v50  ;;  %v3547_v50 = vor.u32 %v4304_v28, %v3544_v29  ;;  %v3675_v35 = vor.u32 %v4336_v30, %v3672_v54  ;;  %v4431_v28 = vld [vmem:[%s6443_s3] sm:$0xff] }
 0x103   : > { %2380 = vmatpush.bf16.msrb.mxu1 %v3723_v43  ;;  %2294 = vmatmul.bf16.gmra.mxu0 %v4889_v44  ;;  %v3803_v44 = vor.u32 %v4368_v27, %v3800_v48  ;;  %v4445_v43 = vld [vmem:[%s6443_s3 + $0x70] sm:$0xff] }
 0x104   : > { %2361 = vmatpush.bf16.msrb.mxu0 %v3595_v19  ;;  %2332 = vmatmul.bf16.gmra.mxu2 %v4902_v51  ;;  %v4438_v19 = vld [vmem:[%s6443_s3 + $0x38] sm:$0xff] }
 0x105   : > { %2418 = vmatpush.bf16.msrb.mxu3 %v3979_v45  ;;  %v4446_v51 = vld [vmem:[%s6443_s3 + $0x78] sm:$0xff]  ;;  %v538_v45 = vperm.slane %v5635_v52, 1 }
 0x106   : > { %2400 = vmatpush.bf16.msrb.mxu2 %v3835_v60  ;;  %2351 = vmatmul.bf16.gmra.mxu3 %v4910_v56 }
 0x107   : > { %2381 = vmatpush.bf16.msrb.mxu1 %v3707_v7  ;;  %v1987_v60 = vadd.f32 %v6109_v2, %v538_v45  ;;  %v1989_v52 = vadd.f32 %v6171_v38, %v538_v45  ;;  %v4443_v2 = vld [vmem:[%s6443_s3 + $0x60] sm:$0xff]  ;;  %v4434_v7 = vld [vmem:[%s6443_s3 + $0x18] sm:$0xff]  ;;  %v1992_v27 = vadd.f32 %v6227_v23, %v538_v45 }
 0x108   : > { %2362 = vmatpush.bf16.msrb.mxu0 %v3579_v61  ;;  %v6259_v37 = vpop.f32.mrf.mxu2  ;;  %v1993_v56 = vpop.f32.mrf.mxu0  ;;  %v4435_v61 = vld [vmem:[%s6443_s3 + $0x20] sm:$0xff] }
 0x109   : > { %2419 = vmatpush.bf16.msrb.mxu3 %v3963_v49  ;;  %v6261_v40 = vpop.f32.mrf.mxu3  ;;  %v6269_v41 = vpop.f32.mrf.mxu1  ;;  %v2006_v38 = vadd.f32 %v6111_v4, %v1987_v60  ;;  %v4442_v49 = vld [vmem:[%s6443_s3 + $0x58] sm:$0xff]  ;;  %v1994_v48 = vadd.f32 %v1993_v56, %v538_v45  ;;  %v4439_v23 = vld [vmem:[%s6443_s3 + $0x40] sm:$0xff]  ;;  %v4452_v45 = vld [vmem:[%s6443_s3 + $0xa8] sm:$0xff] }
 0x10a   : > { %2401 = vmatpush.bf16.msrb.mxu2 %v3819_v25 }
 0x10b   : > { %2382 = vmatpush.bf16.msrb.mxu1 %v3691_v53  ;;  %v2025_v4 = vadd.f32 %v6158_v33, %v2006_v38 }
 0x10c   : > { %2363 = vmatpush.bf16.msrb.mxu0 %v3563_v26  ;;  %v4440_v26 = vld [vmem:[%s6443_s3 + $0x48] sm:$0xff] }
 0x10d   : > { %2420 = vmatpush.bf16.msrb.mxu3 %v3947_v11  ;;  %v2044_v3 = vadd.f32 %v6160_v34, %v2025_v4 }
 0x10e   : > { %2402 = vmatpush.bf16.msrb.mxu2 %v3803_v44 }
 0x10f   : > { %2383 = vmatpush.bf16.msrb.mxu1 %v3675_v35  ;;  %v4453_v35 = vld [vmem:[%s6443_s3 + $0xb0] sm:$0xff] }
 0x110   : > { %2364 = vmatpush.bf16.msrb.mxu0 %v3547_v50  ;;  %v6278_v46 = vpop.f32.mrf.mxu2  ;;  %v2062_v47 = vpop.f32.mrf.mxu0 }
 0x111   : > { %2421 = vmatpush.bf16.msrb.mxu3 %v3931_v36  ;;  %v6280_v42 = vpop.f32.mrf.mxu3  ;;  %v2081_v55 = vpop.f32.mrf.mxu1  ;;  %v2063_v33 = vadd.f32 %v2062_v47, %v2044_v3  ;;  %v6370_v3 = vld [vmem:[%s6442_s2] sm:$0xf] }
 0x112   : > { %2384 = vmatmul.bf16.vlgmr.msrb.gmra.mxu1 %v5031_v1 }
 0x113   : > { %2736 = vmatpush.bf16.msra.mxu1 %v4446_v51  ;;  %2365 = vmatmul.bf16.vlgmr.msrb.gmra.mxu0 %v5029_v0  ;;  %v2008_v0 = vadd.f32 %v6173_v39, %v1989_v52  ;;  %v2082_v53 = vadd.f32 %v2081_v55, %v2063_v33 }
 0x114   : > { %2717 = vmatpush.bf16.msra.mxu0 %v4438_v19  ;;  %2403 = vmatmul.bf16.vlgmr.msrb.gmra.mxu2 %v5042_v5 }
 0x116   : > { %2422 = vmatmul.bf16.vlgmr.msrb.gmra.mxu3 %v5044_v6  ;;  %v2027_v6 = vadd.f32 %v6214_v16, %v2008_v0 }
 0x117   : > { %2737 = vmatpush.bf16.msra.mxu1 %v4445_v43 }
 0x118   : > { %2718 = vmatpush.bf16.msra.mxu0 %v4437_v15  ;;  %v2100_v62 = vpop.f32.mrf.mxu2  ;;  %v2064_v63 = vpop.f32.mrf.mxu0  ;;  %v2046_v39 = vadd.f32 %v6216_v17, %v2027_v6  ;;  %v4432_v17 = vld [vmem:[%s6443_s3 + $0x8] sm:$0xff] }
 0x119   : > { %v2119_v1 = vpop.f32.mrf.mxu3  ;;  %v2083_v5 = vpop.f32.mrf.mxu1  ;;  %v2101_v29 = vadd.f32 %v2100_v62, %v2082_v53 }
 0x11a   : > { %v2065_v16 = vadd.f32 %v2064_v63, %v2046_v39 }
 0x11b   : > { %2738 = vmatpush.bf16.msra.mxu1 %v4444_v59 }
 0x11c   : > { %2719 = vmatpush.bf16.msra.mxu0 %v4436_v58  ;;  %v2084_v34 = vadd.f32 %v2083_v5, %v2065_v16  ;;  %v539_v16 = vperm.slane %v6370_v3, 2 }
 0x11f   : > { %2739 = vmatpush.bf16.msra.mxu1 %v4443_v2  ;;  %v4450_v2 = vld [vmem:[%s6443_s3 + $0x98] sm:$0xff] }
 0x120   : > { %2720 = vmatpush.bf16.msra.mxu0 %v4435_v61  ;;  %v2102_v20 = vpop.f32.mrf.mxu2  ;;  %v2067_v22 = vpop.f32.mrf.mxu0 }
 0x121   : > { %v2121_v21 = vpop.f32.mrf.mxu3  ;;  %v2086_v25 = vpop.f32.mrf.mxu1  ;;  %v2103_v11 = vadd.f32 %v2102_v20, %v2084_v34 }
 0x122   : > { %2389 = vmatmul.bf16.gmra.mxu1 %v5147_v9  ;;  %v2013_v9 = vadd.f32 %v6269_v41, %v1994_v48 }
 0x123   : > { %2740 = vmatpush.bf16.msra.mxu1 %v4442_v49  ;;  %2370 = vmatmul.bf16.gmra.mxu0 %v5145_v8  ;;  %v2011_v8 = vadd.f32 %v6229_v24, %v1992_v27  ;;  %v2122_v44 = vadd.f32 %v2121_v21, %v2103_v11  ;;  %v2120_v24 = vadd.f32 %v2119_v1, %v2101_v29  ;;  %v4449_v1 = vld [vmem:[%s6443_s3 + $0x90] sm:$0xff]  ;;  %v4448_v49 = vld [vmem:[%s6443_s3 + $0x88] sm:$0xff] }
 0x124   : > { %2721 = vmatpush.bf16.msra.mxu0 %v4434_v7  ;;  %2408 = vmatmul.bf16.gmra.mxu2 %v5158_v13  ;;  %v2032_v31 = vadd.f32 %v6278_v46, %v2013_v9 }
 0x125   : > { %v2030_v50 = vadd.f32 %v6259_v37, %v2011_v8  ;;  %v2438_v19 = vmax.f32 %v2122_v44, 0.0  ;;  %v2434_v56 = vmax.f32 %v2120_v24, 0.0 }
 0x126   : > { %2427 = vmatmul.bf16.gmra.mxu3 %v5160_v14  ;;  %v4454_v14 = vld [vmem:[%s6443_s3 + $0xb8] sm:$0xff]  ;;  %v2051_v36 = vadd.f32 %v6280_v42, %v2032_v31 }
 0x127   : > { %2741 = vmatpush.bf16.msra.mxu1 %v4441_v12  ;;  %2755 = vmatpush.bf16.msra.mxu2 %v4454_v14  ;;  %v2049_v51 = vadd.f32 %v6261_v40, %v2030_v50  ;;  %v2450_v47 = vpack.c.bf16 %v2438_v19, %v2434_v56  ;;  %v4451_v40 = vld [vmem:[%s6443_s3 + $0xa0] sm:$0xff] }
 0x128   : > { %2722 = vmatpush.bf16.msra.mxu0 %v4433_v10  ;;  %v2105_v13 = vpop.f32.mrf.mxu2  ;;  %v2069_v54 = vpop.f32.mrf.mxu0  ;;  %v4447_v12 = vld [vmem:[%s6443_s3 + $0x80] sm:$0xff] }
 0x129   : > { %v2124_v30 = vpop.f32.mrf.mxu3  ;;  %v2088_v57 = vpop.f32.mrf.mxu1  ;;  %v2070_v41 = vadd.f32 %v2069_v54, %v2051_v36  ;;  %v2068_v55 = vadd.f32 %v2067_v22, %v2049_v51 }
 0x12b   : > { %2742 = vmatpush.bf16.msra.mxu1 %v4440_v26  ;;  %2756 = vmatpush.bf16.msra.mxu2 %v4453_v35  ;;  %v2089_v58 = vadd.f32 %v2088_v57, %v2070_v41  ;;  %v2087_v42 = vadd.f32 %v2086_v25, %v2068_v55 }
 0x12c   : > { %2723 = vmatpush.bf16.msra.mxu0 %v4432_v17 }
 0x12d   : > { %v2106_v60 = vadd.f32 %v2105_v13, %v2087_v42 }
 0x12f   : > { %2743 = vmatpush.bf16.msra.mxu1 %v4439_v23  ;;  %2757 = vmatpush.bf16.msra.mxu2 %v4452_v45 }
 0x130   : > { %2724 = vmatpush.bf16.msra.mxu0 %v4431_v28  ;;  %v2107_v15 = vpop.f32.mrf.mxu2  ;;  %v2138_v37 = vpop.f32.mrf.mxu0 }
 0x131   : > { %v2126_v43 = vpop.f32.mrf.mxu3  ;;  %v2157_v46 = vpop.f32.mrf.mxu1  ;;  %v2108_v59 = vadd.f32 %v2107_v15, %v2089_v58  ;;  %v2139_v22 = vadd.f32 %v2138_v37, %v539_v16 }
 0x132   : > { %2744 = vmatmul.bf16.vlgmr.msra.gmra.mxu1 %v2450_v47 }
 0x133   : > { %2725 = vmatmul.bf16.vlgmr.msra.gmra.mxu0 %v6058_v18  ;;  %2758 = vmatpush.bf16.msra.mxu2 %v4451_v40  ;;  %v2127_v62 = vadd.f32 %v2126_v43, %v2108_v59  ;;  %v2125_v18 = vadd.f32 %v2124_v30, %v2106_v60  ;;  %v2158_v17 = vadd.f32 %v2157_v46, %v2139_v22 }
 0x135   : > { %v2446_v63 = vmax.f32 %v2127_v62, 0.0  ;;  %v2442_v5 = vmax.f32 %v2125_v18, 0.0  ;;  %v4461_v18 = vld [vmem:[%s6443_s3 + $0xf0] sm:$0xff] }
 0x137   : > { %2759 = vmatpush.bf16.msra.mxu2 %v4450_v2  ;;  %v2454_v10 = vpack.c.bf16 %v2446_v63, %v2442_v5 }
 0x138   : > { %v2176_v52 = vpop.f32.mrf.mxu2  ;;  %v2140_v38 = vpop.f32.mrf.mxu0 }
 0x139   : > { %v2195_v61 = vpop.f32.mrf.mxu3  ;;  %v2159_v0 = vpop.f32.mrf.mxu1  ;;  %v2177_v48 = vadd.f32 %v2176_v52, %v2158_v17  ;;  %v4462_v52 = vld [vmem:[%s6443_s3 + $0xf8] sm:$0xff] }
 0x13a   : > { %2774 = vmatpush.bf16.msra.mxu3 %v4462_v52  ;;  %v4458_v17 = vld [vmem:[%s6443_s3 + $0xd8] sm:$0xff] }
 0x13b   : > { %2760 = vmatpush.bf16.msra.mxu2 %v4449_v1  ;;  %v2196_v28 = vadd.f32 %v2195_v61, %v2177_v48 }
 0x13e   : > { %2775 = vmatpush.bf16.msra.mxu3 %v4461_v18 }
 0x13f   : > { %2761 = vmatpush.bf16.msra.mxu2 %v4448_v49 }
 0x140   : > { %v2178_v6 = vpop.f32.mrf.mxu2  ;;  %v2143_v4 = vpop.f32.mrf.mxu0 }
 0x141   : > { %v2197_v7 = vpop.f32.mrf.mxu3  ;;  %v2162_v39 = vpop.f32.mrf.mxu1  ;;  %v2144_v30 = vadd.f32 %v2143_v4, %v539_v16 }
 0x142   : > { %2749 = vmatmul.bf16.gmra.mxu1 %v2454_v10 }
 0x143   : > { %2730 = vmatmul.bf16.gmra.mxu0 %v6156_v32  ;;  %2762 = vmatpush.bf16.msra.mxu2 %v4447_v12  ;;  %v2141_v32 = vadd.f32 %v2140_v38, %v539_v16  ;;  %v2163_v44 = vadd.f32 %v2162_v39, %v2144_v30 }
 0x145   : > { %v2160_v11 = vadd.f32 %v2159_v0, %v2141_v32 }
 0x147   : > { %v2179_v23 = vadd.f32 %v2178_v6, %v2160_v11 }
 0x148   : > { %v2181_v20 = vpop.f32.mrf.mxu2  ;;  %v2145_v25 = vpop.f32.mrf.mxu0 }
 0x149   : > { %v2200_v21 = vpop.f32.mrf.mxu3  ;;  %v2164_v33 = vpop.f32.mrf.mxu1  ;;  %v2198_v13 = vadd.f32 %v2197_v7, %v2179_v23  ;;  %v2146_v24 = vadd.f32 %v2145_v25, %v539_v16  ;;  %v2182_v51 = vadd.f32 %v2181_v20, %v2163_v44  ;;  %v4460_v7 = vld [vmem:[%s6443_s3 + $0xe8] sm:$0xff]  ;;  %v4459_v16 = vld [vmem:[%s6443_s3 + $0xe0] sm:$0xff] }
 0x14a   : > { %2776 = vmatpush.bf16.msra.mxu3 %v4460_v7  ;;  %v4455_v23 = vld [vmem:[%s6443_s3 + $0xc0] sm:$0xff] }
 0x14b   : > { %v2165_v45 = vadd.f32 %v2164_v33, %v2146_v24  ;;  %v2201_v46 = vadd.f32 %v2200_v21, %v2182_v51 }
 0x14e   : > { %2777 = vmatpush.bf16.msra.mxu3 %v4459_v16 }
 0x150   : > { %v2183_v26 = vpop.f32.mrf.mxu2  ;;  %v2214_v34 = vpop.f32.mrf.mxu0 }
 0x151   : > { %v2202_v27 = vpop.f32.mrf.mxu3  ;;  %v2233_v53 = vpop.f32.mrf.mxu1  ;;  %v2215_v8 = vadd.f32 %v2214_v34, %v2196_v28  ;;  %v2184_v47 = vadd.f32 %v2183_v26, %v2165_v45 }
 0x152   : > { %2778 = vmatpush.bf16.msra.mxu3 %v4458_v17 }
 0x153   : > { %v2234_v57 = vadd.f32 %v2233_v53, %v2215_v8  ;;  %v2203_v61 = vadd.f32 %v2202_v27, %v2184_v47  ;;  %v4457_v27 = vld [vmem:[%s6443_s3 + $0xd0] sm:$0xff]  ;;  %v4456_v53 = vld [vmem:[%s6443_s3 + $0xc8] sm:$0xff]  ;;  %v540_v8 = vperm.slane %v6370_v3, 3 }
 0x156   : > { %2779 = vmatpush.bf16.msra.mxu3 %v4457_v27 }
 0x158   : > { %v2252_v9 = vpop.f32.mrf.mxu2  ;;  %v2216_v14 = vpop.f32.mrf.mxu0 }
 0x159   : > { %v2271_v29 = vpop.f32.mrf.mxu3  ;;  %v2235_v54 = vpop.f32.mrf.mxu1  ;;  %v2217_v31 = vadd.f32 %v2216_v14, %v2198_v13  ;;  %v2253_v50 = vadd.f32 %v2252_v9, %v2234_v57 }
 0x15a   : > { %2780 = vmatpush.bf16.msra.mxu3 %v4456_v53 }
 0x15b   : > { %v2236_v35 = vadd.f32 %v2235_v54, %v2217_v31  ;;  %v2272_v56 = vadd.f32 %v2271_v29, %v2253_v50 }
 0x15d   : > { %v2435_v55 = vmax.f32 %v2272_v56, 0.0 }
 0x15e   : > { %2781 = vmatpush.bf16.msra.mxu3 %v4455_v23 }
 0x160   : > { %v2254_v36 = vpop.f32.mrf.mxu2  ;;  %v2219_v15 = vpop.f32.mrf.mxu0 }
 0x161   : > { %v2273_v19 = vpop.f32.mrf.mxu3  ;;  %v2255_v41 = vadd.f32 %v2254_v36, %v2236_v35  ;;  %v2238_v43 = vpop.f32.mrf.mxu1  ;;  %v2220_v42 = vadd.f32 %v2219_v15, %v2201_v46 }
 0x163   : > { %v2274_v37 = vadd.f32 %v2273_v19, %v2255_v41  ;;  %v2239_v0 = vadd.f32 %v2238_v43, %v2220_v42 }
 0x165   : > { %v2439_v58 = vmax.f32 %v2274_v37, 0.0 }
 0x167   : > { %v2451_v40 = vpack.c.bf16 %v2439_v58, %v2435_v55 }
 0x168   : > { %v2257_v59 = vpop.f32.mrf.mxu2  ;;  %v2221_v2 = vpop.f32.mrf.mxu0 }
 0x169   : > { %v2276_v60 = vpop.f32.mrf.mxu3  ;;  %2763 = vmatmul.bf16.vlgmr.msra.gmra.mxu2 %v2451_v40  ;;  %v2240_v38 = vpop.f32.mrf.mxu1  ;;  %v2222_v62 = vadd.f32 %v2221_v2, %v2203_v61  ;;  %v2258_v1 = vadd.f32 %v2257_v59, %v2239_v0 }
 0x16b   : > { %v2241_v63 = vadd.f32 %v2240_v38, %v2222_v62  ;;  %v2277_v49 = vadd.f32 %v2276_v60, %v2258_v1 }
 0x16d   : > { %v2443_v20 = vmax.f32 %v2277_v49, 0.0 }
 0x170   : > { %v2259_v5 = vpop.f32.mrf.mxu2  ;;  %v2290_v39 = vpop.f32.mrf.mxu0 }
 0x171   : > { %v2278_v6 = vpop.f32.mrf.mxu3  ;;  %v2260_v4 = vadd.f32 %v2259_v5, %v2241_v63  ;;  %v2309_v10 = vpop.f32.mrf.mxu1  ;;  %v2291_v13 = vadd.f32 %v2290_v39, %v540_v8 }
 0x173   : > { %v2279_v12 = vadd.f32 %v2278_v6, %v2260_v4  ;;  %v2310_v54 = vadd.f32 %v2309_v10, %v2291_v13 }
 0x175   : > { %v2447_v21 = vmax.f32 %v2279_v12, 0.0 }
 0x177   : > { %v2455_v22 = vpack.c.bf16 %v2447_v21, %v2443_v20 }
 0x178   : > { %v2328_v25 = vpop.f32.mrf.mxu2  ;;  %v2292_v32 = vpop.f32.mrf.mxu0 }
 0x179   : > { %v2347_v33 = vpop.f32.mrf.mxu3  ;;  %2768 = vmatmul.bf16.gmra.mxu2 %v2455_v22  ;;  %v2311_v26 = vpop.f32.mrf.mxu1  ;;  %v2293_v57 = vadd.f32 %v2292_v32, %v540_v8  ;;  %v2329_v50 = vadd.f32 %v2328_v25, %v2310_v54 }
 0x17b   : > { %v2312_v36 = vadd.f32 %v2311_v26, %v2293_v57  ;;  %v2348_v19 = vadd.f32 %v2347_v33, %v2329_v50 }
 0x180   : > { %v2330_v48 = vpop.f32.mrf.mxu2  ;;  %v2295_v11 = vpop.f32.mrf.mxu0 }
 0x181   : > { %v2349_v34 = vpop.f32.mrf.mxu3  ;;  %v2314_v28 = vpop.f32.mrf.mxu1  ;;  %v2331_v51 = vadd.f32 %v2330_v48, %v2312_v36  ;;  %v2296_v43 = vadd.f32 %v2295_v11, %v540_v8 }
 0x183   : > { %v2350_v3 = vadd.f32 %v2349_v34, %v2331_v51  ;;  %v2315_v55 = vadd.f32 %v2314_v28, %v2296_v43  ;;  %v4476_v28 = vld [vmem:[%s6444_s4] ss:$0 sm:$0xff] }
 0x188   : > { %v2333_v9 = vpop.f32.mrf.mxu2  ;;  %v2297_v30 = vpop.f32.mrf.mxu0 }
 0x189   : > { %v2352_v29 = vpop.f32.mrf.mxu3  ;;  %v2316_v14 = vpop.f32.mrf.mxu1  ;;  %v2298_v40 = vadd.f32 %v2297_v30, %v540_v8  ;;  %v2334_v52 = vadd.f32 %v2333_v9, %v2315_v55 }
 0x18b   : > { %v2317_v0 = vadd.f32 %v2316_v14, %v2298_v40  ;;  %v2353_v1 = vadd.f32 %v2352_v29, %v2334_v52 }
 0x190   : > { %v2335_v31 = vpop.f32.mrf.mxu2  ;;  %v2366_v24 = vpop.f32.mrf.mxu0 }
 0x191   : > { %v2354_v44 = vpop.f32.mrf.mxu3  ;;  %v2385_v35 = vpop.f32.mrf.mxu1  ;;  %v2367_v56 = vadd.f32 %v2366_v24, %v2348_v19  ;;  %v2336_v63 = vadd.f32 %v2335_v31, %v2317_v0 }
 0x193   : > { %v2386_v46 = vadd.f32 %v2385_v35, %v2367_v56  ;;  %v2355_v10 = vadd.f32 %v2354_v44, %v2336_v63 }
 0x198   : > { %v2404_v41 = vpop.f32.mrf.mxu2  ;;  %v2368_v45 = vpop.f32.mrf.mxu0 }
 0x199   : > { %v2423_v15 = vpop.f32.mrf.mxu3  ;;  %v2387_v37 = vpop.f32.mrf.mxu1  ;;  %v2369_v47 = vadd.f32 %v2368_v45, %v2350_v3  ;;  %v2405_v58 = vadd.f32 %v2404_v41, %v2386_v46 }
 0x19b   : > { %v2388_v42 = vadd.f32 %v2387_v37, %v2369_v47  ;;  %v2424_v61 = vadd.f32 %v2423_v15, %v2405_v58 }
 0x19d   : > { %v2436_v5 = vmax.f32 %v2424_v61, 0.0 }
 0x1a0   : > { %v2406_v59 = vpop.f32.mrf.mxu2  ;;  %v2371_v38 = vpop.f32.mrf.mxu0 }
 0x1a1   : > { %v2425_v60 = vpop.f32.mrf.mxu3  ;;  %v2407_v2 = vadd.f32 %v2406_v59, %v2388_v42  ;;  %v2390_v18 = vpop.f32.mrf.mxu1  ;;  %v2372_v49 = vadd.f32 %v2371_v38, %v2353_v1 }
 0x1a3   : > { %v2426_v62 = vadd.f32 %v2425_v60, %v2407_v2  ;;  %v2391_v16 = vadd.f32 %v2390_v18, %v2372_v49  ;;  %v4503_v60 = vmov 0  }
 0x1a4   : > { %4473 = vset.pattern.permute.xlu1 %v4503_v60  ;;  %4474 = vset.pattern.permute.xlu2 %v4503_v60 }
 0x1a5   : > { %v2440_v6 = vmax.f32 %v2426_v62, 0.0  ;;  %4475 = vset.pattern.permute.xlu0 %v4503_v60 }
 0x1a7   : > { %v2452_v7 = vpack.c.bf16 %v2440_v6, %v2436_v5 }
 0x1a8   : > { %v2409_v4 = vpop.f32.mrf.mxu2  ;;  %v2373_v12 = vpop.f32.mrf.mxu0 }
 0x1a9   : > { %v2428_v39 = vpop.f32.mrf.mxu3  ;;  %2782 = vmatmul.bf16.vlgmr.msra.gmra.mxu3 %v2452_v7  ;;  %v2374_v20 = vadd.f32 %v2373_v12, %v2355_v10  ;;  %v2410_v21 = vadd.f32 %v2409_v4, %v2391_v16  ;;  %v2392_v22 = vpop.f32.mrf.mxu1 }
 0x1ab   : > { %v2393_v25 = vadd.f32 %v2392_v22, %v2374_v20  ;;  %v2429_v17 = vadd.f32 %v2428_v39, %v2410_v21 }
 0x1ad   : > { %v2444_v48 = vmax.f32 %v2429_v17, 0.0 }
 0x1b0   : > { %v2411_v33 = vpop.f32.mrf.mxu2  ;;  %v2726_v11 = vpop.f32.mrf.mxu0 }
 0x1b1   : > { %v2412_v32 = vadd.f32 %v2411_v33, %v2393_v25  ;;  %v2430_v26 = vpop.f32.mrf.mxu3  ;;  %v2745_v23 = vpop.f32.mrf.mxu1  ;;  %v2727_v9 = vadd.f32 %v4476_v28, %v2726_v11 }
 0x1b3   : > { %v2431_v27 = vadd.f32 %v2430_v26, %v2412_v32  ;;  %v2746_v13 = vadd.f32 %v2745_v23, %v2727_v9 }
 0x1b5   : > { %v2448_v34 = vmax.f32 %v2431_v27, 0.0 }
 0x1b7   : > { %v2456_v53 = vpack.c.bf16 %v2448_v34, %v2444_v48 }
 0x1b8   : > { %v2728_v29 = vpop.f32.mrf.mxu0 }
 0x1b9   : > { %2787 = vmatmul.bf16.gmra.mxu3 %v2456_v53  ;;  %v2747_v30 = vpop.f32.mrf.mxu1  ;;  %v2729_v31 = vadd.f32 %v4476_v28, %v2728_v29 }
 0x1bb   : > { %v2748_v24 = vadd.f32 %v2747_v30, %v2729_v31 }
 0x1c0   : > { %v2731_v50 = vpop.f32.mrf.mxu0 }
 0x1c1   : > { %v2732_v19 = vadd.f32 %v4476_v28, %v2731_v50  ;;  %v2750_v56 = vpop.f32.mrf.mxu1 }
 0x1c3   : > { %v2751_v15 = vadd.f32 %v2750_v56, %v2732_v19 }
 0x1c8   : > { %v2733_v3 = vpop.f32.mrf.mxu0 }
 0x1c9   : > { %v2734_v37 = vadd.f32 %v4476_v28, %v2733_v3  ;;  %v2752_v47 = vpop.f32.mrf.mxu1 }
 0x1cb   : > { %v2753_v58 = vadd.f32 %v2752_v47, %v2734_v37 }
 0x1ec   : > { %v2764_v8 = vpop.f32.mrf.mxu2 }
 0x1ed   : > { %v2765_v14 = vadd.f32 %v2764_v8, %v2746_v13 }
 0x1f4   : > { %v2766_v54 = vpop.f32.mrf.mxu2 }
 0x1f5   : > { %v2767_v35 = vadd.f32 %v2766_v54, %v2748_v24 }
 0x1fc   : > { %v2769_v41 = vpop.f32.mrf.mxu2 }
 0x1fd   : > { %v2770_v43 = vadd.f32 %v2769_v41, %v2751_v15 }
 0x204   : > { %v2771_v55 = vpop.f32.mrf.mxu2 }
 0x205   : > { %v2772_v40 = vadd.f32 %v2771_v55, %v2753_v58 }
 0x22c   : > { %v2783_v57 = vpop.f32.mrf.mxu3 }
 0x22d   : > { %v6401_v44 = vadd.f32 %v2783_v57, %v2765_v14 }
 0x22f   : > { %2797 = vrot.lane.b32.xlu0 %v6401_v44, %s4502_s23 }
 0x234   : > { %v2785_v36 = vpop.f32.mrf.mxu3 }
 0x235   : > { %v6404_v51 = vadd.f32 %v2785_v36, %v2767_v35 }
 0x237   : > { %2799 = vrot.lane.b32.xlu0 %v6404_v51, %s4502_s23 }
 0x23c   : > { %v2788_v45 = vpop.f32.mrf.mxu3 }
 0x23d   : > { %v6407_v46 = vadd.f32 %v2788_v45, %v2770_v43 }
 0x23f   : > { %2801 = vrot.lane.b32.xlu1 %v6407_v46, %s4502_s23 }
 0x244   : > { %v2790_v42 = vpop.f32.mrf.mxu3 }
 0x245   : > { %v6410_v59 = vadd.f32 %v2790_v42, %v2772_v40 }
 0x247   : > { %2803 = vrot.lane.b32.xlu1 %v6410_v59, %s4502_s23 }
 0x2a1   : > { %v2798_v52 = vpop.permute.xlu0 %2797 }
 0x2a2   : > { %v2809_v61 = vsub.f32 %v6401_v44, %v2798_v52 }
 0x2a4   : > { %v2813_v2 = vmul.f32 1.442695, %v2809_v61 }
 0x2a6   : > { %4477 = vpow2.f32 %v2813_v2 }
 0x2a9   : > { %v2800_v38 = vpop.permute.xlu0 %2799 }
 0x2aa   : > { %v2810_v0 = vsub.f32 %v6404_v51, %v2800_v38 }
 0x2ac   : > { %v4478_v62 = vpop.eup %4477  ;;  %v2815_v18 = vmul.f32 1.442695, %v2810_v0  ;;  %v2889_v0 = vlaneseq }
 0x2ad   : > { %v2821_v1 = vadd.f32 1.0, %v4478_v62 }
 0x2ae   : > { %4479 = vpow2.f32 %v2815_v18  ;;  %v2890_v62 = vand.u32 127, %v2889_v0 }
 0x2af   : > { %4481 = vrcp.f32 %v2821_v1  ;;  %v2836_v16 = vand.u32 2147483648, %v2821_v1  ;;  %v2834_v22 = vand.u32 2147483647, %v2821_v1  ;;  %vm2830_vm1 = vweird.f32 %v2821_v1 }
 0x2b1   : > { %v2802_v63 = vpop.permute.xlu1 %2801  ;;  %v2837_v27 = vor.u32 1.1754944e-38, %v2836_v16  ;;  %vm2835_vm3 = vcmp.eq.f32.partialorder %v2834_v22, 8.507059e+37 }
 0x2b2   : > { %v2811_v5 = vsub.f32 %v6407_v46, %v2802_v63 }
 0x2b4   : > { %v4480_v6 = vpop.eup %4479  ;;  %v2817_v7 = vmul.f32 1.442695, %v2811_v5 }
 0x2b5   : > { %v4482_v49 = vpop.eup %4481  ;;  %v2822_v4 = vadd.f32 1.0, %v4480_v6 }
 0x2b6   : > { %4483 = vpow2.f32 %v2817_v7  ;;  %v2826_v39 = vmul.f32 %v4482_v49, %v2821_v1  ;;  %vm2831_vm0 = vweird.f32 %v4482_v49 }
 0x2b7   : > { %4485 = vrcp.f32 %v2822_v4  ;;  %vm2832_vm2 = vmor %vm2830_vm1, %vm2831_vm0  ;;  %v2851_v23 = vand.u32 2147483648, %v2822_v4  ;;  %v2849_v9 = vand.u32 2147483647, %v2822_v4  ;;  %vm2845_vm5 = vweird.f32 %v2822_v4 }
 0x2b8   : > { %v2827_v10 = vsub.f32 1.0, %v2826_v39  ;;  %vm2891_vm0 = vcmp.eq.s32.totalorder %v2890_v62, 2  ;;  %vm2920_vm1 = vcmp.eq.s32.totalorder %v2890_v62, 3 }
 0x2b9   : > { %v2804_v12 = vpop.permute.xlu1 %2803  ;;  %v2852_v54 = vor.u32 1.1754944e-38, %v2851_v23  ;;  %vm2850_vm7 = vcmp.eq.f32.partialorder %v2849_v9, 8.507059e+37 }
 0x2ba   : > { %v2812_v20 = vsub.f32 %v6410_v59, %v2804_v12  ;;  %v2828_v21 = vmul.f32 %v4482_v49, %v2827_v10 }
 0x2bc   : > { %v4484_v25 = vpop.eup %4483  ;;  %v2819_v33 = vmul.f32 1.442695, %v2812_v20  ;;  %v2829_v17 = vadd.f32 %v4482_v49, %v2828_v21 }
 0x2bd   : > { %v4486_v32 = vpop.eup %4485  ;;  %v2823_v26 = vadd.f32 1.0, %v4484_v25 }
 0x2be   : > { %4487 = vpow2.f32 %v2819_v33  ;;  %v2833_v48 = vsel %vm2832_vm2, %v4482_v49, %v2829_v17  ;;  %v2841_v34 = vmul.f32 %v4486_v32, %v2822_v4  ;;  %vm2846_vm4 = vweird.f32 %v4486_v32 }
 0x2bf   : > { %4489 = vrcp.f32 %v2823_v26  ;;  %v2838_v53 = vsel %vm2835_vm3, %v2837_v27, %v2833_v48  ;;  %vm2847_vm6 = vmor %vm2845_vm5, %vm2846_vm4  ;;  %v2866_v36 = vand.u32 2147483648, %v2823_v26  ;;  %v2864_v56 = vand.u32 2147483647, %v2823_v26 }
 0x2c0   : > { %2923 = vperm.xlu1 %4473, %v2838_v53   ;;  %v2885_v11 = vsub.f32 1.0, %v2838_v53  ;;  %v2842_v28 = vsub.f32 1.0, %v2841_v34  ;;  %vm2860_vm9 = vweird.f32 %v2823_v26  ;;  %vm2949_vm2 = vcmask 64512  }
 0x2c1   : > { %v2867_v3 = vor.u32 1.1754944e-38, %v2866_v36  ;;  %vm2865_vm11 = vcmp.eq.f32.partialorder %v2864_v56, 8.507059e+37 }
 0x2c2   : > { %2894 = vperm.xlu2 %4474, %v2885_v11   ;;  %v2843_v8 = vmul.f32 %v4486_v32, %v2842_v28 }
 0x2c4   : > { %v4488_v29 = vpop.eup %4487  ;;  %v2844_v13 = vadd.f32 %v4486_v32, %v2843_v8 }
 0x2c5   : > { %v4490_v30 = vpop.eup %4489  ;;  %v2824_v14 = vadd.f32 1.0, %v4488_v29 }
 0x2c6   : > { %v2856_v57 = vmul.f32 %v4490_v30, %v2823_v26  ;;  %v2848_v31 = vsel %vm2847_vm6, %v4486_v32, %v2844_v13  ;;  %vm2861_vm8 = vweird.f32 %v4490_v30 }
 0x2c7   : > { %4491 = vrcp.f32 %v2824_v14  ;;  %v2853_v50 = vsel %vm2850_vm7, %v2852_v54, %v2848_v31  ;;  %vm2862_vm10 = vmor %vm2860_vm9, %vm2861_vm8  ;;  %v2881_v58 = vand.u32 2147483648, %v2824_v14  ;;  %v2879_v42 = vand.u32 2147483647, %v2824_v14 }
 0x2c8   : > { %2928 = vperm.xlu1 %4473, %v2853_v50   ;;  %v2886_v24 = vsub.f32 1.0, %v2853_v50  ;;  %v2857_v35 = vsub.f32 1.0, %v2856_v57  ;;  %vm2875_vm13 = vweird.f32 %v2824_v14 }
 0x2c9   : > { %v2882_v52 = vor.u32 1.1754944e-38, %v2881_v58  ;;  %vm2880_vm15 = vcmp.eq.f32.partialorder %v2879_v42, 8.507059e+37 }
 0x2ca   : > { %2899 = vperm.xlu2 %4474, %v2886_v24   ;;  %v2858_v19 = vmul.f32 %v4490_v30, %v2857_v35 }
 0x2cc   : > { %v2859_v41 = vadd.f32 %v4490_v30, %v2858_v19 }
 0x2cd   : > { %v4492_v15 = vpop.eup %4491 }
 0x2ce   : > { %v2863_v43 = vsel %vm2862_vm10, %v4490_v30, %v2859_v41  ;;  %v2871_v45 = vmul.f32 %v4492_v15, %v2824_v14  ;;  %vm2876_vm12 = vweird.f32 %v4492_v15 }
 0x2cf   : > { %v2868_v37 = vsel %vm2865_vm11, %v2867_v3, %v2863_v43  ;;  %vm2877_vm14 = vmor %vm2875_vm13, %vm2876_vm12 }
 0x2d0   : > { %v2887_v47 = vsub.f32 1.0, %v2868_v37  ;;  %v2872_v55 = vsub.f32 1.0, %v2871_v45 }
 0x2d2   : > { %2904 = vperm.xlu0 %4475, %v2887_v47   ;;  %v2873_v40 = vmul.f32 %v4492_v15, %v2872_v55 }
 0x2d4   : > { %v2874_v60 = vadd.f32 %v4492_v15, %v2873_v40 }
 0x2d6   : > { %v2878_v61 = vsel %vm2877_vm14, %v4492_v15, %v2874_v60 }
 0x2d7   : > { %v2883_v2 = vsel %vm2880_vm15, %v2882_v52, %v2878_v61 }
 0x2d8   : > { %v2888_v38 = vsub.f32 1.0, %v2883_v2 }
 0x2da   : > { %2938 = vperm.xlu0 %4475, %v2883_v2   ;;  %2909 = vperm.xlu2 %4474, %v2888_v38  }
 0x2e2   : > { %2933 = vperm.xlu2 %4474, %v2868_v37  }
 0x31c   : > { %v2895_v18 = vpop.permute.xlu2 %2894 }
 0x31d   : > { %v2912_v1 = vsel %vm2891_vm0, %v2895_v18, 0.0 }
 0x31e   : > { %v2916_v63 = vadd.f32 %v2912_v1, %v6401_v44 }
 0x324   : > { %v2900_v5 = vpop.permute.xlu2 %2899 }
 0x325   : > { %v2913_v4 = vsel %vm2891_vm0, %v2900_v5, 0.0 }
 0x326   : > { %v2917_v39 = vadd.f32 %v2913_v4, %v6404_v51 }
 0x332   : > { %v2924_v6 = vpop.permute.xlu1 %2923 }
 0x333   : > { %v2941_v7 = vsel %vm2920_vm1, %v2924_v6, 0.0 }
 0x334   : > { %v2945_v49 = vadd.f32 %v2941_v7, %v2916_v63  ;;  %v2910_v10 = vpop.permute.xlu2 %2909 }
 0x335   : > { %v2915_v32 = vsel %vm2891_vm0, %v2910_v10, 0.0 }
 0x336   : > { %2950 = vst.msk [vmem:[%s229_s27] sm:$0xff] %vm2949_vm2, %v2945_v49  ;;  %v2919_v51 = vadd.f32 %v2915_v32, %v6410_v59 }
 0x33a   : > { %v2929_v12 = vpop.permute.xlu1 %2928 }
 0x33b   : > { %v2942_v44 = vsel %vm2920_vm1, %v2929_v12, 0.0 }
 0x33c   : > { %v2946_v16 = vadd.f32 %v2942_v44, %v2917_v39  ;;  %v2934_v20 = vpop.permute.xlu2 %2933 }
 0x33d   : > { %v2943_v33 = vsel %vm2920_vm1, %v2934_v20, 0.0 }
 0x33e   : > { %2951 = vst.msk [vmem:[%s229_s27 + $0x8] sm:$0xff] %vm2949_vm2, %v2946_v16 }
 0x344   : > { %v2905_v21 = vpop.permute.xlu0 %2904 }
 0x345   : > { %v2914_v22 = vsel %vm2891_vm0, %v2905_v21, 0.0 }
 0x346   : > { %v2918_v25 = vadd.f32 %v2914_v22, %v6407_v46 }
 0x348   : > { %v2947_v17 = vadd.f32 %v2943_v33, %v2918_v25 }
 0x34a   : > { %2952 = vst.msk [vmem:[%s229_s27 + $0x10] sm:$0xff] %vm2949_vm2, %v2947_v17 }
 0x34c   : > { %v2939_v26 = vpop.permute.xlu0 %2938 }
 0x34d   : > { %v2944_v27 = vsel %vm2920_vm1, %v2939_v26, 0.0 }
 0x34e   : > { %v2948_v48 = vadd.f32 %v2944_v27, %v2919_v51 }
 0x350   : > { %2953 = vst.msk [vmem:[%s229_s27 + $0x18] sm:$0xff] %vm2949_vm2, %v2948_v48 }
 0x351 PF: > { %s15_s18 = sadd.s32 1, %s4500_s18  }
 0x352   : > { %p12_p4 = scmp.ge.s32.totalorder %s15_s18, 4  }
 0x354   :  { %14 = sbr.rel (!%p12_p4) target bundleno = 1 (0x1), region = 70 }

</bundles_post_ra>
